<compile_context>
chip_gen: v7x
topology: tpu7x:2x2x1
jax: 0.10.0
libtpu: 0.0.40
codegen_flags: <defaults>
</compile_context>

<pallas_src>
import numpy as np

import jax
import jax.numpy as jnp
from jax.experimental import pallas as pl
from jax.experimental.pallas import tpu as pltpu


def _round_up(n, m):
    return ((n + m - 1) // m) * m


# ------------------------------- kernel ------------------------------------


def _lenet5_kernel(x_ref, w1_ref, b1_ref, w2_ref, b2_ref,
                   wf1_ref, bf1_ref, wf2_ref, bf2_ref, wf3_ref, bf3_ref,
                   out_ref, h1_ref, h2_ref):
    """LeNet-5 forward for one batch tile; everything stays on-chip.

    Row layout of every activation: row = spatial_row * bt + image_in_tile.
    Conv taps therefore become contiguous aligned row slices, and the batch
    rides along the matmul M dimension.
    """
    f32, bf16 = jnp.float32, jnp.bfloat16
    KH = 5

    bt = out_ref.shape[1]                 # batch tile (multiple of 8)
    H = x_ref.shape[1] // bt              # 32
    OH1 = H - (KH - 1)                    # 28
    PH1 = OH1 // 2                        # 14
    OH2 = PH1 - (KH - 1)                  # 10
    PH2 = OH2 // 2                        # 5

    # ---- conv1 + bias + ReLU: one big-K MXU matmul (M = 28*bt, K = 160) ----
    lhs1 = jnp.concatenate(
        [x_ref[0, kh * bt:(kh + OH1) * bt, :] for kh in range(KH)], axis=-1)
    y1 = jnp.dot(lhs1, w1_ref[...], preferred_element_type=f32) + b1_ref[...]
    y1 = jnp.maximum(y1, 0.0)                                  # (28*bt, 168) f32

    # ---- pool1 row half (f32 VPU adds); column half folded into w2 --------
    for p in range(PH1):
        h1_ref[p * bt:(p + 1) * bt, :] = (
            0.5 * (y1[(2 * p) * bt:(2 * p + 1) * bt, :]
                   + y1[(2 * p + 1) * bt:(2 * p + 2) * bt, :])).astype(bf16)

    # ---- conv2 (+ pool1 cols) + bias + ReLU: M = 10*bt, K = 840 ------------
    lhs2 = jnp.concatenate(
        [h1_ref[kh * bt:(kh + OH2) * bt, :] for kh in range(KH)], axis=-1)
    y2 = jnp.dot(lhs2, w2_ref[...], preferred_element_type=f32) + b2_ref[...]
    y2 = jnp.maximum(y2, 0.0)                                  # (10*bt, 160) f32

    # ---- pool2 row half; column half + NCHW flatten folded into wf1 -------
    for p in range(PH2):
        h2_ref[p * bt:(p + 1) * bt, :] = (
            0.5 * (y2[(2 * p) * bt:(2 * p + 1) * bt, :]
                   + y2[(2 * p + 1) * bt:(2 * p + 2) * bt, :])).astype(bf16)

    # ---- fc1 + ReLU: M = bt, K = 800, N = 128 (lane padded) ----------------
    lhs3 = jnp.concatenate(
        [h2_ref[h * bt:(h + 1) * bt, :] for h in range(PH2)], axis=-1)
    a1 = jnp.dot(lhs3, wf1_ref[...], preferred_element_type=f32) + bf1_ref[...]
    a1 = jnp.maximum(a1, 0.0).astype(bf16)                     # (bt, 128)

    # ---- fc2 + ReLU ---------------------------------------------------------
    a2 = jnp.dot(a1, wf2_ref[...], preferred_element_type=f32) + bf2_ref[...]
    a2 = jnp.maximum(a2, 0.0).astype(bf16)                     # (bt, 128)

    # ---- fc3 (logits, zero-padded to 128 lanes -> unmasked store) ----------
    a3 = jnp.dot(a2, wf3_ref[...], preferred_element_type=f32) + bf3_ref[...]
    out_ref[0] = a3                                            # (bt, 128) f32


# --------------------------- parameter packing ------------------------------


def init_params(key, input_channels=1, num_classes=10):
    """Deterministic synthetic params mirroring torch default init shapes."""

    def uniform(k, shape, fan_in):
        bound = 1.0 / jnp.sqrt(jnp.float32(fan_in))
        return jax.random.uniform(k, shape, jnp.float32, -bound, bound)

    ks = jax.random.split(key, 10)
    p = {}
    p["conv1_w"] = uniform(ks[0], (6, input_channels, 5, 5), input_channels * 25)
    p["conv1_b"] = uniform(ks[1], (6,), input_channels * 25)
    p["conv2_w"] = uniform(ks[2], (16, 6, 5, 5), 6 * 25)
    p["conv2_b"] = uniform(ks[3], (16,), 6 * 25)
    p["fc1_w"] = uniform(ks[4], (120, 16 * 5 * 5), 16 * 5 * 5)
    p["fc1_b"] = uniform(ks[5], (120,), 16 * 5 * 5)
    p["fc2_w"] = uniform(ks[6], (84, 120), 120)
    p["fc2_b"] = uniform(ks[7], (84,), 120)
    p["fc3_w"] = uniform(ks[8], (num_classes, 84), 84)
    p["fc3_b"] = uniform(ks[9], (num_classes,), 84)
    return p


def pack_params(params, *, input_channels=1, height=32, width=32):
    """One-time repack of torch-layout weights into kernel matrices.

    Convs become width-Toeplitz matrices (one matmul per conv in the kernel);
    each AvgPool's column half (x0.5) is folded into the next layer's weight;
    the torch NCHW flatten is folded into fc1's row permutation; fc weights /
    biases are zero-padded to 128 lanes.  Nothing here depends on the batch
    tile.
    """
    KH = KW = 5
    C1, C2, NP = 6, 16, 128
    Cin, H, W = input_channels, height, width
    OH1, OW1 = H - KH + 1, W - KW + 1        # 28, 28
    PH1, PW1 = OH1 // 2, OW1 // 2            # 14, 14
    OH2, OW2 = PH1 - KH + 1, PW1 - KW + 1    # 10, 10
    PH2, PW2 = OH2 // 2, OW2 // 2            # 5, 5
    assert C2 * PH2 * PW2 == params["fc1_w"].shape[1]

    # conv1: rows (kh, w, ci), cols (ow1, co)
    w1 = np.asarray(params["conv1_w"], np.float32)             # (6, Cin, 5, 5)
    W1 = np.zeros((KH, W, Cin, OW1, C1), np.float32)
    for kw in range(KW):
        tap = np.transpose(w1[:, :, :, kw], (2, 1, 0))         # (KH, Cin, C1)
        for ow in range(OW1):
            W1[:, ow + kw, :, ow, :] = tap
    W1 = W1.reshape(KH * W * Cin, OW1 * C1)

    # conv2 with pool1's column half (x0.5) folded in:
    # rows (kh, ow1<28, ci<6), cols (ow2, co)
    w2 = np.asarray(params["conv2_w"], np.float32)             # (16, 6, 5, 5)
    W2 = np.zeros((KH, OW1, C1, OW2, C2), np.float32)
    for kw in range(KW):
        tap = 0.5 * np.transpose(w2[:, :, :, kw], (2, 1, 0))   # (KH, 6, 16)
        for ow2 in range(OW2):
            q = ow2 + kw                                       # pooled column
            W2[:, 2 * q, :, ow2, :] = tap
            W2[:, 2 * q + 1, :, ow2, :] = tap
    W2 = W2.reshape(KH * OW1 * C1, OW2 * C2)

    # fc1 with pool2's column half (x0.5) and the torch NCHW flatten folded in:
    # rows (ph, ow2<10, c<16), cols padded to 128.
    # TODO(synk): torch module calls self.flatten without defining it;
    # nn.Flatten(start_dim=1) NCHW semantics assumed here.
    fc1_w = np.asarray(params["fc1_w"], np.float32)            # (120, 400)
    src = fc1_w.reshape(-1, C2, PH2, PW2)                      # (j, c, ph, pw)
    Wf1 = np.zeros((PH2, OW2, C2, NP), np.float32)
    for ow2 in range(OW2):
        Wf1[:, ow2, :, :fc1_w.shape[0]] = (
            0.5 * np.transpose(src[:, :, :, ow2 // 2], (2, 1, 0)))  # (ph, c, j)
    Wf1 = Wf1.reshape(PH2 * OW2 * C2, NP)

    fc2_w = np.asarray(params["fc2_w"], np.float32)            # (84, 120)
    Wf2 = np.zeros((NP, NP), np.float32)
    Wf2[:fc2_w.shape[1], :fc2_w.shape[0]] = fc2_w.T
    fc3_w = np.asarray(params["fc3_w"], np.float32)            # (num_classes, 84)
    Wf3 = np.zeros((NP, NP), np.float32)
    Wf3[:fc3_w.shape[1], :fc3_w.shape[0]] = fc3_w.T

    def bias_row(b, n):
        b = np.asarray(b, np.float32)
        out = np.zeros((1, n), np.float32)
        out[0, :b.shape[0]] = b
        return out

    b1 = np.tile(np.asarray(params["conv1_b"], np.float32), OW1)[None, :]
    b2 = np.tile(np.asarray(params["conv2_b"], np.float32), OW2)[None, :]

    bf16, f32 = jnp.bfloat16, jnp.float32
    return {
        "w1": jnp.asarray(W1, bf16), "b1": jnp.asarray(b1, f32),
        "w2": jnp.asarray(W2, bf16), "b2": jnp.asarray(b2, f32),
        "wf1": jnp.asarray(Wf1, bf16), "bf1": jnp.asarray(bias_row(params["fc1_b"], NP), f32),
        "wf2": jnp.asarray(Wf2, bf16), "bf2": jnp.asarray(bias_row(params["fc2_b"], NP), f32),
        "wf3": jnp.asarray(Wf3, bf16), "bf3": jnp.asarray(bias_row(params["fc3_b"], NP), f32),
    }


# ------------------------------- forward ------------------------------------


def lenet5_forward(x_nchw, packed, *, num_classes=10, batch_tile=32):
    """Batch-tiled fused LeNet-5 forward.  Pick batch sizes with
    B / batch_tile >= 2 to let the 'parallel' grid axis use both TensorCores
    on v7x-class chips."""
    B, Cin, H, W = x_nchw.shape
    KH = 5
    C1, C2, NP = 6, 16, 128
    OH1, OW1 = H - KH + 1, W - KH + 1
    PH1, PW1 = OH1 // 2, OW1 // 2
    OH2, OW2 = PH1 - KH + 1, PW1 - KH + 1
    PH2, PW2 = OH2 // 2, OW2 // 2

    bt = _round_up(min(batch_tile, _round_up(B, 8)), 8)        # batch tile
    B_pad = _round_up(B, bt)
    nt = B_pad // bt

    # Row-major / batch-inner packing: tile t, row r*bt + b -> image t*bt + b,
    # input row r, lanes = (w, ci).  (A lane-denser 8x128 input repack would
    # further improve the HBM->VMEM DMA; secondary to the matmul restructure.)
    x = jnp.transpose(x_nchw, (0, 2, 3, 1)).reshape(B, H, W * Cin)
    if B_pad != B:
        x = jnp.pad(x, ((0, B_pad - B), (0, 0), (0, 0)))
    x = (x.reshape(nt, bt, H, W * Cin)
          .transpose(0, 2, 1, 3)
          .reshape(nt, H * bt, W * Cin)
          .astype(jnp.bfloat16))

    order = ["w1", "b1", "w2", "b2", "wf1", "bf1", "wf2", "bf2", "wf3", "bf3"]
    wargs = [packed[k] for k in order]

    in_specs = [pl.BlockSpec((1, H * bt, W * Cin), lambda i: (i, 0, 0))]
    # Whole-array weight blocks, constant index_map -> VMEM-resident across grid.
    in_specs += [pl.BlockSpec(a.shape, lambda i: (0, 0)) for a in wargs]

    flops = 2 * B_pad * (OH1 * OW1 * KH * KH * Cin * C1
                         + OH2 * OW2 * KH * KH * C1 * C2
                         + (C2 * PH2 * PW2) * 120 + 120 * 84 + 84 * num_classes)
    bytes_accessed = int(x.size * 2
                         + sum(int(a.size) * int(a.dtype.itemsize) for a in wargs)
                         + B_pad * NP * 4)

    out = pl.pallas_call(
        _lenet5_kernel,
        grid=(nt,),
        in_specs=in_specs,
        out_specs=pl.BlockSpec((1, bt, NP), lambda i: (i, 0, 0)),
        out_shape=jax.ShapeDtypeStruct((nt, bt, NP), jnp.float32),
        scratch_shapes=[pltpu.VMEM((PH1 * bt, OW1 * C1), jnp.bfloat16),   # h1
                        pltpu.VMEM((PH2 * bt, OW2 * C2), jnp.bfloat16)],  # h2
        compiler_params=pltpu.CompilerParams(
            dimension_semantics=("parallel",)),
        cost_estimate=pl.CostEstimate(flops=int(flops), transcendentals=0,
                                      bytes_accessed=bytes_accessed),
    )(x, *wargs)

    return out.reshape(B_pad, NP)[:B, :num_classes]


if __name__ == "__main__":
    key = jax.random.PRNGKey(0)
    k_params, k_x = jax.random.split(key)
    params = init_params(k_params, input_channels=1, num_classes=10)
    packed = pack_params(params, input_channels=1, height=32, width=32)

    # fc1 expects 16*5*5 features => input must be 1x32x32 (classic LeNet-5).
    x = jax.random.normal(k_x, (2, 1, 32, 32), dtype=jnp.float32)

    fwd = jax.jit(lambda xx: lenet5_forward(xx, packed, num_classes=10,
                                            batch_tile=32))
    logits = fwd(x)
    jax.block_until_ready(logits)
    assert logits.shape == (2, 10) and logits.dtype == jnp.float32
    assert bool(jnp.all(jnp.isfinite(logits)))
    print("KERNEL_OK")
</pallas_src>

<mosaic_0001>
module attributes {stable_mosaic.version = 11 : i64} {
  func.func @_lenet5_kernel(%arg0: i32, %arg1: memref<1x256x32xbf16, #tpu.memory_space<vmem>>, %arg2: memref<160x168xbf16, #tpu.memory_space<vmem>>, %arg3: memref<1x168xf32, #tpu.memory_space<vmem>>, %arg4: memref<840x160xbf16, #tpu.memory_space<vmem>>, %arg5: memref<1x160xf32, #tpu.memory_space<vmem>>, %arg6: memref<800x128xbf16, #tpu.memory_space<vmem>>, %arg7: memref<1x128xf32, #tpu.memory_space<vmem>>, %arg8: memref<128x128xbf16, #tpu.memory_space<vmem>>, %arg9: memref<1x128xf32, #tpu.memory_space<vmem>>, %arg10: memref<128x128xbf16, #tpu.memory_space<vmem>>, %arg11: memref<1x128xf32, #tpu.memory_space<vmem>>, %arg12: memref<1x8x128xf32, #tpu.memory_space<vmem>>, %arg13: memref<112x168xbf16, #tpu.memory_space<vmem>>, %arg14: memref<40x160xbf16, #tpu.memory_space<vmem>>) attributes {dimension_semantics = [#tpu.dimension_semantics<parallel>], iteration_bounds = array<i64: 1>, scalar_prefetch = 0 : i64, scratch_operands = 2 : i64, tpu.core_type = #tpu.core_type<tc>, window_params = [{transform_indices = @transform_0, window_bounds = array<i64: 1, 256, 32>}, {pipeline_mode = #tpu.pipeline_mode<synchronous>, transform_indices = @transform_1, window_bounds = array<i64: 160, 168>}, {pipeline_mode = #tpu.pipeline_mode<synchronous>, transform_indices = @transform_2, window_bounds = array<i64: 1, 168>}, {pipeline_mode = #tpu.pipeline_mode<synchronous>, transform_indices = @transform_3, window_bounds = array<i64: 840, 160>}, {pipeline_mode = #tpu.pipeline_mode<synchronous>, transform_indices = @transform_4, window_bounds = array<i64: 1, 160>}, {pipeline_mode = #tpu.pipeline_mode<synchronous>, transform_indices = @transform_5, window_bounds = array<i64: 800, 128>}, {pipeline_mode = #tpu.pipeline_mode<synchronous>, transform_indices = @transform_6, window_bounds = array<i64: 1, 128>}, {pipeline_mode = #tpu.pipeline_mode<synchronous>, transform_indices = @transform_7, window_bounds = array<i64: 128, 128>}, {pipeline_mode = #tpu.pipeline_mode<synchronous>, transform_indices = @transform_8, window_bounds = array<i64: 1, 128>}, {pipeline_mode = #tpu.pipeline_mode<synchronous>, transform_indices = @transform_9, window_bounds = array<i64: 128, 128>}, {pipeline_mode = #tpu.pipeline_mode<synchronous>, transform_indices = @transform_10, window_bounds = array<i64: 1, 128>}, {transform_indices = @transform_11, window_bounds = array<i64: 1, 8, 128>}]} {
    %c0 = arith.constant 0 : index
    %c0_0 = arith.constant 0 : index
    %c0_1 = arith.constant 0 : index
    %0 = vector.load %arg1[%c0, %c0_0, %c0_1] : memref<1x256x32xbf16, #tpu.memory_space<vmem>>, vector<1x224x32xbf16>
    %1 = vector.shape_cast %0 : vector<1x224x32xbf16> to vector<224x32xbf16>
    %c0_2 = arith.constant 0 : index
    %c8 = arith.constant 8 : index
    %c0_3 = arith.constant 0 : index
    %2 = vector.load %arg1[%c0_2, %c8, %c0_3] : memref<1x256x32xbf16, #tpu.memory_space<vmem>>, vector<1x224x32xbf16>
    %3 = vector.shape_cast %2 : vector<1x224x32xbf16> to vector<224x32xbf16>
    %c0_4 = arith.constant 0 : index
    %c16 = arith.constant 16 : index
    %c0_5 = arith.constant 0 : index
    %4 = vector.load %arg1[%c0_4, %c16, %c0_5] : memref<1x256x32xbf16, #tpu.memory_space<vmem>>, vector<1x224x32xbf16>
    %5 = vector.shape_cast %4 : vector<1x224x32xbf16> to vector<224x32xbf16>
    %c0_6 = arith.constant 0 : index
    %c24 = arith.constant 24 : index
    %c0_7 = arith.constant 0 : index
    %6 = vector.load %arg1[%c0_6, %c24, %c0_7] : memref<1x256x32xbf16, #tpu.memory_space<vmem>>, vector<1x224x32xbf16>
    %7 = vector.shape_cast %6 : vector<1x224x32xbf16> to vector<224x32xbf16>
    %c0_8 = arith.constant 0 : index
    %c32 = arith.constant 32 : index
    %c0_9 = arith.constant 0 : index
    %8 = vector.load %arg1[%c0_8, %c32, %c0_9] : memref<1x256x32xbf16, #tpu.memory_space<vmem>>, vector<1x224x32xbf16>
    %9 = vector.shape_cast %8 : vector<1x224x32xbf16> to vector<224x32xbf16>
    %10 = tpu.concatenate %1, %3, %5, %7, %9 in 1 : vector<224x32xbf16>, vector<224x32xbf16>, vector<224x32xbf16>, vector<224x32xbf16>, vector<224x32xbf16> -> vector<224x160xbf16>
    %c0_10 = arith.constant 0 : index
    %c0_11 = arith.constant 0 : index
    %11 = vector.load %arg2[%c0_10, %c0_11] : memref<160x168xbf16, #tpu.memory_space<vmem>>, vector<160x168xbf16>
    %cst = arith.constant dense<0.000000e+00> : vector<224x168xf32>
    %12 = tpu.matmul %10, %11, %cst {dimension_numbers = #tpu.dot_dimension_numbers<[1], [0], [0], [1], [0, 0, 1, 1], [], []>} : vector<224x160xbf16>, vector<160x168xbf16>, vector<224x168xf32> -> vector<224x168xf32>
    %c0_12 = arith.constant 0 : index
    %c0_13 = arith.constant 0 : index
    %13 = vector.load %arg3[%c0_12, %c0_13] : memref<1x168xf32, #tpu.memory_space<vmem>>, vector<1x168xf32>
    %14 = vector.broadcast %13 : vector<1x168xf32> to vector<224x168xf32>
    %15 = arith.addf %12, %14 : vector<224x168xf32>
    %cst_14 = arith.constant 0.000000e+00 : f32
    %16 = vector.broadcast %cst_14 : f32 to vector<224x168xf32>
    %17 = arith.maximumf %15, %16 : vector<224x168xf32>
    %18 = vector.extract_strided_slice %17 {offsets = [0, 0], sizes = [8, 168], strides = [1, 1]} : vector<224x168xf32> to vector<8x168xf32>
    %19 = vector.extract_strided_slice %17 {offsets = [8, 0], sizes = [8, 168], strides = [1, 1]} : vector<224x168xf32> to vector<8x168xf32>
    %20 = arith.addf %18, %19 : vector<8x168xf32>
    %cst_15 = arith.constant 5.000000e-01 : f32
    %21 = vector.broadcast %cst_15 : f32 to vector<8x168xf32>
    %22 = arith.mulf %21, %20 : vector<8x168xf32>
    %23 = arith.truncf %22 : vector<8x168xf32> to vector<8x168xbf16>
    %c0_16 = arith.constant 0 : index
    %c0_17 = arith.constant 0 : index
    %24 = vector.load %arg13[%c0_16, %c0_17] : memref<112x168xbf16, #tpu.memory_space<vmem>>, vector<8x168xbf16>
    tpu.vector_store %arg13[%c0_16, %c0_17], %23 {strides = array<i32>} : memref<112x168xbf16, #tpu.memory_space<vmem>>, vector<8x168xbf16>,
    %25 = vector.extract_strided_slice %17 {offsets = [16, 0], sizes = [8, 168], strides = [1, 1]} : vector<224x168xf32> to vector<8x168xf32>
    %26 = vector.extract_strided_slice %17 {offsets = [24, 0], sizes = [8, 168], strides = [1, 1]} : vector<224x168xf32> to vector<8x168xf32>
    %27 = arith.addf %25, %26 : vector<8x168xf32>
    %cst_18 = arith.constant 5.000000e-01 : f32
    %28 = vector.broadcast %cst_18 : f32 to vector<8x168xf32>
    %29 = arith.mulf %28, %27 : vector<8x168xf32>
    %30 = arith.truncf %29 : vector<8x168xf32> to vector<8x168xbf16>
    %c8_19 = arith.constant 8 : index
    %c0_20 = arith.constant 0 : index
    %31 = vector.load %arg13[%c8_19, %c0_20] : memref<112x168xbf16, #tpu.memory_space<vmem>>, vector<8x168xbf16>
    tpu.vector_store %arg13[%c8_19, %c0_20], %30 {strides = array<i32>} : memref<112x168xbf16, #tpu.memory_space<vmem>>, vector<8x168xbf16>,
    %32 = vector.extract_strided_slice %17 {offsets = [32, 0], sizes = [8, 168], strides = [1, 1]} : vector<224x168xf32> to vector<8x168xf32>
    %33 = vector.extract_strided_slice %17 {offsets = [40, 0], sizes = [8, 168], strides = [1, 1]} : vector<224x168xf32> to vector<8x168xf32>
    %34 = arith.addf %32, %33 : vector<8x168xf32>
    %cst_21 = arith.constant 5.000000e-01 : f32
    %35 = vector.broadcast %cst_21 : f32 to vector<8x168xf32>
    %36 = arith.mulf %35, %34 : vector<8x168xf32>
    %37 = arith.truncf %36 : vector<8x168xf32> to vector<8x168xbf16>
    %c16_22 = arith.constant 16 : index
    %c0_23 = arith.constant 0 : index
    %38 = vector.load %arg13[%c16_22, %c0_23] : memref<112x168xbf16, #tpu.memory_space<vmem>>, vector<8x168xbf16>
    tpu.vector_store %arg13[%c16_22, %c0_23], %37 {strides = array<i32>} : memref<112x168xbf16, #tpu.memory_space<vmem>>, vector<8x168xbf16>,
    %39 = vector.extract_strided_slice %17 {offsets = [48, 0], sizes = [8, 168], strides = [1, 1]} : vector<224x168xf32> to vector<8x168xf32>
    %40 = vector.extract_strided_slice %17 {offsets = [56, 0], sizes = [8, 168], strides = [1, 1]} : vector<224x168xf32> to vector<8x168xf32>
    %41 = arith.addf %39, %40 : vector<8x168xf32>
    %cst_24 = arith.constant 5.000000e-01 : f32
    %42 = vector.broadcast %cst_24 : f32 to vector<8x168xf32>
    %43 = arith.mulf %42, %41 : vector<8x168xf32>
    %44 = arith.truncf %43 : vector<8x168xf32> to vector<8x168xbf16>
    %c24_25 = arith.constant 24 : index
    %c0_26 = arith.constant 0 : index
    %45 = vector.load %arg13[%c24_25, %c0_26] : memref<112x168xbf16, #tpu.memory_space<vmem>>, vector<8x168xbf16>
    tpu.vector_store %arg13[%c24_25, %c0_26], %44 {strides = array<i32>} : memref<112x168xbf16, #tpu.memory_space<vmem>>, vector<8x168xbf16>,
    %46 = vector.extract_strided_slice %17 {offsets = [64, 0], sizes = [8, 168], strides = [1, 1]} : vector<224x168xf32> to vector<8x168xf32>
    %47 = vector.extract_strided_slice %17 {offsets = [72, 0], sizes = [8, 168], strides = [1, 1]} : vector<224x168xf32> to vector<8x168xf32>
    %48 = arith.addf %46, %47 : vector<8x168xf32>
    %cst_27 = arith.constant 5.000000e-01 : f32
    %49 = vector.broadcast %cst_27 : f32 to vector<8x168xf32>
    %50 = arith.mulf %49, %48 : vector<8x168xf32>
    %51 = arith.truncf %50 : vector<8x168xf32> to vector<8x168xbf16>
    %c32_28 = arith.constant 32 : index
    %c0_29 = arith.constant 0 : index
    %52 = vector.load %arg13[%c32_28, %c0_29] : memref<112x168xbf16, #tpu.memory_space<vmem>>, vector<8x168xbf16>
    tpu.vector_store %arg13[%c32_28, %c0_29], %51 {strides = array<i32>} : memref<112x168xbf16, #tpu.memory_space<vmem>>, vector<8x168xbf16>,
    %53 = vector.extract_strided_slice %17 {offsets = [80, 0], sizes = [8, 168], strides = [1, 1]} : vector<224x168xf32> to vector<8x168xf32>
    %54 = vector.extract_strided_slice %17 {offsets = [88, 0], sizes = [8, 168], strides = [1, 1]} : vector<224x168xf32> to vector<8x168xf32>
    %55 = arith.addf %53, %54 : vector<8x168xf32>
    %cst_30 = arith.constant 5.000000e-01 : f32
    %56 = vector.broadcast %cst_30 : f32 to vector<8x168xf32>
    %57 = arith.mulf %56, %55 : vector<8x168xf32>
    %58 = arith.truncf %57 : vector<8x168xf32> to vector<8x168xbf16>
    %c40 = arith.constant 40 : index
    %c0_31 = arith.constant 0 : index
    %59 = vector.load %arg13[%c40, %c0_31] : memref<112x168xbf16, #tpu.memory_space<vmem>>, vector<8x168xbf16>
    tpu.vector_store %arg13[%c40, %c0_31], %58 {strides = array<i32>} : memref<112x168xbf16, #tpu.memory_space<vmem>>, vector<8x168xbf16>,
    %60 = vector.extract_strided_slice %17 {offsets = [96, 0], sizes = [8, 168], strides = [1, 1]} : vector<224x168xf32> to vector<8x168xf32>
    %61 = vector.extract_strided_slice %17 {offsets = [104, 0], sizes = [8, 168], strides = [1, 1]} : vector<224x168xf32> to vector<8x168xf32>
    %62 = arith.addf %60, %61 : vector<8x168xf32>
    %cst_32 = arith.constant 5.000000e-01 : f32
    %63 = vector.broadcast %cst_32 : f32 to vector<8x168xf32>
    %64 = arith.mulf %63, %62 : vector<8x168xf32>
    %65 = arith.truncf %64 : vector<8x168xf32> to vector<8x168xbf16>
    %c48 = arith.constant 48 : index
    %c0_33 = arith.constant 0 : index
    %66 = vector.load %arg13[%c48, %c0_33] : memref<112x168xbf16, #tpu.memory_space<vmem>>, vector<8x168xbf16>
    tpu.vector_store %arg13[%c48, %c0_33], %65 {strides = array<i32>} : memref<112x168xbf16, #tpu.memory_space<vmem>>, vector<8x168xbf16>,
    %67 = vector.extract_strided_slice %17 {offsets = [112, 0], sizes = [8, 168], strides = [1, 1]} : vector<224x168xf32> to vector<8x168xf32>
    %68 = vector.extract_strided_slice %17 {offsets = [120, 0], sizes = [8, 168], strides = [1, 1]} : vector<224x168xf32> to vector<8x168xf32>
    %69 = arith.addf %67, %68 : vector<8x168xf32>
    %cst_34 = arith.constant 5.000000e-01 : f32
    %70 = vector.broadcast %cst_34 : f32 to vector<8x168xf32>
    %71 = arith.mulf %70, %69 : vector<8x168xf32>
    %72 = arith.truncf %71 : vector<8x168xf32> to vector<8x168xbf16>
    %c56 = arith.constant 56 : index
    %c0_35 = arith.constant 0 : index
    %73 = vector.load %arg13[%c56, %c0_35] : memref<112x168xbf16, #tpu.memory_space<vmem>>, vector<8x168xbf16>
    tpu.vector_store %arg13[%c56, %c0_35], %72 {strides = array<i32>} : memref<112x168xbf16, #tpu.memory_space<vmem>>, vector<8x168xbf16>,
    %74 = vector.extract_strided_slice %17 {offsets = [128, 0], sizes = [8, 168], strides = [1, 1]} : vector<224x168xf32> to vector<8x168xf32>
    %75 = vector.extract_strided_slice %17 {offsets = [136, 0], sizes = [8, 168], strides = [1, 1]} : vector<224x168xf32> to vector<8x168xf32>
    %76 = arith.addf %74, %75 : vector<8x168xf32>
    %cst_36 = arith.constant 5.000000e-01 : f32
    %77 = vector.broadcast %cst_36 : f32 to vector<8x168xf32>
    %78 = arith.mulf %77, %76 : vector<8x168xf32>
    %79 = arith.truncf %78 : vector<8x168xf32> to vector<8x168xbf16>
    %c64 = arith.constant 64 : index
    %c0_37 = arith.constant 0 : index
    %80 = vector.load %arg13[%c64, %c0_37] : memref<112x168xbf16, #tpu.memory_space<vmem>>, vector<8x168xbf16>
    tpu.vector_store %arg13[%c64, %c0_37], %79 {strides = array<i32>} : memref<112x168xbf16, #tpu.memory_space<vmem>>, vector<8x168xbf16>,
    %81 = vector.extract_strided_slice %17 {offsets = [144, 0], sizes = [8, 168], strides = [1, 1]} : vector<224x168xf32> to vector<8x168xf32>
    %82 = vector.extract_strided_slice %17 {offsets = [152, 0], sizes = [8, 168], strides = [1, 1]} : vector<224x168xf32> to vector<8x168xf32>
    %83 = arith.addf %81, %82 : vector<8x168xf32>
    %cst_38 = arith.constant 5.000000e-01 : f32
    %84 = vector.broadcast %cst_38 : f32 to vector<8x168xf32>
    %85 = arith.mulf %84, %83 : vector<8x168xf32>
    %86 = arith.truncf %85 : vector<8x168xf32> to vector<8x168xbf16>
    %c72 = arith.constant 72 : index
    %c0_39 = arith.constant 0 : index
    %87 = vector.load %arg13[%c72, %c0_39] : memref<112x168xbf16, #tpu.memory_space<vmem>>, vector<8x168xbf16>
    tpu.vector_store %arg13[%c72, %c0_39], %86 {strides = array<i32>} : memref<112x168xbf16, #tpu.memory_space<vmem>>, vector<8x168xbf16>,
    %88 = vector.extract_strided_slice %17 {offsets = [160, 0], sizes = [8, 168], strides = [1, 1]} : vector<224x168xf32> to vector<8x168xf32>
    %89 = vector.extract_strided_slice %17 {offsets = [168, 0], sizes = [8, 168], strides = [1, 1]} : vector<224x168xf32> to vector<8x168xf32>
    %90 = arith.addf %88, %89 : vector<8x168xf32>
    %cst_40 = arith.constant 5.000000e-01 : f32
    %91 = vector.broadcast %cst_40 : f32 to vector<8x168xf32>
    %92 = arith.mulf %91, %90 : vector<8x168xf32>
    %93 = arith.truncf %92 : vector<8x168xf32> to vector<8x168xbf16>
    %c80 = arith.constant 80 : index
    %c0_41 = arith.constant 0 : index
    %94 = vector.load %arg13[%c80, %c0_41] : memref<112x168xbf16, #tpu.memory_space<vmem>>, vector<8x168xbf16>
    tpu.vector_store %arg13[%c80, %c0_41], %93 {strides = array<i32>} : memref<112x168xbf16, #tpu.memory_space<vmem>>, vector<8x168xbf16>,
    %95 = vector.extract_strided_slice %17 {offsets = [176, 0], sizes = [8, 168], strides = [1, 1]} : vector<224x168xf32> to vector<8x168xf32>
    %96 = vector.extract_strided_slice %17 {offsets = [184, 0], sizes = [8, 168], strides = [1, 1]} : vector<224x168xf32> to vector<8x168xf32>
    %97 = arith.addf %95, %96 : vector<8x168xf32>
    %cst_42 = arith.constant 5.000000e-01 : f32
    %98 = vector.broadcast %cst_42 : f32 to vector<8x168xf32>
    %99 = arith.mulf %98, %97 : vector<8x168xf32>
    %100 = arith.truncf %99 : vector<8x168xf32> to vector<8x168xbf16>
    %c88 = arith.constant 88 : index
    %c0_43 = arith.constant 0 : index
    %101 = vector.load %arg13[%c88, %c0_43] : memref<112x168xbf16, #tpu.memory_space<vmem>>, vector<8x168xbf16>
    tpu.vector_store %arg13[%c88, %c0_43], %100 {strides = array<i32>} : memref<112x168xbf16, #tpu.memory_space<vmem>>, vector<8x168xbf16>,
    %102 = vector.extract_strided_slice %17 {offsets = [192, 0], sizes = [8, 168], strides = [1, 1]} : vector<224x168xf32> to vector<8x168xf32>
    %103 = vector.extract_strided_slice %17 {offsets = [200, 0], sizes = [8, 168], strides = [1, 1]} : vector<224x168xf32> to vector<8x168xf32>
    %104 = arith.addf %102, %103 : vector<8x168xf32>
    %cst_44 = arith.constant 5.000000e-01 : f32
    %105 = vector.broadcast %cst_44 : f32 to vector<8x168xf32>
    %106 = arith.mulf %105, %104 : vector<8x168xf32>
    %107 = arith.truncf %106 : vector<8x168xf32> to vector<8x168xbf16>
    %c96 = arith.constant 96 : index
    %c0_45 = arith.constant 0 : index
    %108 = vector.load %arg13[%c96, %c0_45] : memref<112x168xbf16, #tpu.memory_space<vmem>>, vector<8x168xbf16>
    tpu.vector_store %arg13[%c96, %c0_45], %107 {strides = array<i32>} : memref<112x168xbf16, #tpu.memory_space<vmem>>, vector<8x168xbf16>,
    %109 = vector.extract_strided_slice %17 {offsets = [208, 0], sizes = [8, 168], strides = [1, 1]} : vector<224x168xf32> to vector<8x168xf32>
    %110 = vector.extract_strided_slice %17 {offsets = [216, 0], sizes = [8, 168], strides = [1, 1]} : vector<224x168xf32> to vector<8x168xf32>
    %111 = arith.addf %109, %110 : vector<8x168xf32>
    %cst_46 = arith.constant 5.000000e-01 : f32
    %112 = vector.broadcast %cst_46 : f32 to vector<8x168xf32>
    %113 = arith.mulf %112, %111 : vector<8x168xf32>
    %114 = arith.truncf %113 : vector<8x168xf32> to vector<8x168xbf16>
    %c104 = arith.constant 104 : index
    %c0_47 = arith.constant 0 : index
    %115 = vector.load %arg13[%c104, %c0_47] : memref<112x168xbf16, #tpu.memory_space<vmem>>, vector<8x168xbf16>
    tpu.vector_store %arg13[%c104, %c0_47], %114 {strides = array<i32>} : memref<112x168xbf16, #tpu.memory_space<vmem>>, vector<8x168xbf16>,
    %c0_48 = arith.constant 0 : index
    %c0_49 = arith.constant 0 : index
    %116 = vector.load %arg13[%c0_48, %c0_49] : memref<112x168xbf16, #tpu.memory_space<vmem>>, vector<80x168xbf16>
    %c8_50 = arith.constant 8 : index
    %c0_51 = arith.constant 0 : index
    %117 = vector.load %arg13[%c8_50, %c0_51] : memref<112x168xbf16, #tpu.memory_space<vmem>>, vector<80x168xbf16>
    %c16_52 = arith.constant 16 : index
    %c0_53 = arith.constant 0 : index
    %118 = vector.load %arg13[%c16_52, %c0_53] : memref<112x168xbf16, #tpu.memory_space<vmem>>, vector<80x168xbf16>
    %c24_54 = arith.constant 24 : index
    %c0_55 = arith.constant 0 : index
    %119 = vector.load %arg13[%c24_54, %c0_55] : memref<112x168xbf16, #tpu.memory_space<vmem>>, vector<80x168xbf16>
    %c32_56 = arith.constant 32 : index
    %c0_57 = arith.constant 0 : index
    %120 = vector.load %arg13[%c32_56, %c0_57] : memref<112x168xbf16, #tpu.memory_space<vmem>>, vector<80x168xbf16>
    %121 = tpu.concatenate %116, %117, %118, %119, %120 in 1 : vector<80x168xbf16>, vector<80x168xbf16>, vector<80x168xbf16>, vector<80x168xbf16>, vector<80x168xbf16> -> vector<80x840xbf16>
    %c0_58 = arith.constant 0 : index
    %c0_59 = arith.constant 0 : index
    %122 = vector.load %arg4[%c0_58, %c0_59] : memref<840x160xbf16, #tpu.memory_space<vmem>>, vector<840x160xbf16>
    %cst_60 = arith.constant dense<0.000000e+00> : vector<80x160xf32>
    %123 = tpu.matmul %121, %122, %cst_60 {dimension_numbers = #tpu.dot_dimension_numbers<[1], [0], [0], [1], [0, 0, 1, 1], [], []>} : vector<80x840xbf16>, vector<840x160xbf16>, vector<80x160xf32> -> vector<80x160xf32>
    %c0_61 = arith.constant 0 : index
    %c0_62 = arith.constant 0 : index
    %124 = vector.load %arg5[%c0_61, %c0_62] : memref<1x160xf32, #tpu.memory_space<vmem>>, vector<1x160xf32>
    %125 = vector.broadcast %124 : vector<1x160xf32> to vector<80x160xf32>
    %126 = arith.addf %123, %125 : vector<80x160xf32>
    %cst_63 = arith.constant 0.000000e+00 : f32
    %127 = vector.broadcast %cst_63 : f32 to vector<80x160xf32>
    %128 = arith.maximumf %126, %127 : vector<80x160xf32>
    %129 = vector.extract_strided_slice %128 {offsets = [0, 0], sizes = [8, 160], strides = [1, 1]} : vector<80x160xf32> to vector<8x160xf32>
    %130 = vector.extract_strided_slice %128 {offsets = [8, 0], sizes = [8, 160], strides = [1, 1]} : vector<80x160xf32> to vector<8x160xf32>
    %131 = arith.addf %129, %130 : vector<8x160xf32>
    %cst_64 = arith.constant 5.000000e-01 : f32
    %132 = vector.broadcast %cst_64 : f32 to vector<8x160xf32>
    %133 = arith.mulf %132, %131 : vector<8x160xf32>
    %134 = arith.truncf %133 : vector<8x160xf32> to vector<8x160xbf16>
    %c0_65 = arith.constant 0 : index
    %c0_66 = arith.constant 0 : index
    %135 = vector.load %arg14[%c0_65, %c0_66] : memref<40x160xbf16, #tpu.memory_space<vmem>>, vector<8x160xbf16>
    tpu.vector_store %arg14[%c0_65, %c0_66], %134 {strides = array<i32>} : memref<40x160xbf16, #tpu.memory_space<vmem>>, vector<8x160xbf16>,
    %136 = vector.extract_strided_slice %128 {offsets = [16, 0], sizes = [8, 160], strides = [1, 1]} : vector<80x160xf32> to vector<8x160xf32>
    %137 = vector.extract_strided_slice %128 {offsets = [24, 0], sizes = [8, 160], strides = [1, 1]} : vector<80x160xf32> to vector<8x160xf32>
    %138 = arith.addf %136, %137 : vector<8x160xf32>
    %cst_67 = arith.constant 5.000000e-01 : f32
    %139 = vector.broadcast %cst_67 : f32 to vector<8x160xf32>
    %140 = arith.mulf %139, %138 : vector<8x160xf32>
    %141 = arith.truncf %140 : vector<8x160xf32> to vector<8x160xbf16>
    %c8_68 = arith.constant 8 : index
    %c0_69 = arith.constant 0 : index
    %142 = vector.load %arg14[%c8_68, %c0_69] : memref<40x160xbf16, #tpu.memory_space<vmem>>, vector<8x160xbf16>
    tpu.vector_store %arg14[%c8_68, %c0_69], %141 {strides = array<i32>} : memref<40x160xbf16, #tpu.memory_space<vmem>>, vector<8x160xbf16>,
    %143 = vector.extract_strided_slice %128 {offsets = [32, 0], sizes = [8, 160], strides = [1, 1]} : vector<80x160xf32> to vector<8x160xf32>
    %144 = vector.extract_strided_slice %128 {offsets = [40, 0], sizes = [8, 160], strides = [1, 1]} : vector<80x160xf32> to vector<8x160xf32>
    %145 = arith.addf %143, %144 : vector<8x160xf32>
    %cst_70 = arith.constant 5.000000e-01 : f32
    %146 = vector.broadcast %cst_70 : f32 to vector<8x160xf32>
    %147 = arith.mulf %146, %145 : vector<8x160xf32>
    %148 = arith.truncf %147 : vector<8x160xf32> to vector<8x160xbf16>
    %c16_71 = arith.constant 16 : index
    %c0_72 = arith.constant 0 : index
    %149 = vector.load %arg14[%c16_71, %c0_72] : memref<40x160xbf16, #tpu.memory_space<vmem>>, vector<8x160xbf16>
    tpu.vector_store %arg14[%c16_71, %c0_72], %148 {strides = array<i32>} : memref<40x160xbf16, #tpu.memory_space<vmem>>, vector<8x160xbf16>,
    %150 = vector.extract_strided_slice %128 {offsets = [48, 0], sizes = [8, 160], strides = [1, 1]} : vector<80x160xf32> to vector<8x160xf32>
    %151 = vector.extract_strided_slice %128 {offsets = [56, 0], sizes = [8, 160], strides = [1, 1]} : vector<80x160xf32> to vector<8x160xf32>
    %152 = arith.addf %150, %151 : vector<8x160xf32>
    %cst_73 = arith.constant 5.000000e-01 : f32
    %153 = vector.broadcast %cst_73 : f32 to vector<8x160xf32>
    %154 = arith.mulf %153, %152 : vector<8x160xf32>
    %155 = arith.truncf %154 : vector<8x160xf32> to vector<8x160xbf16>
    %c24_74 = arith.constant 24 : index
    %c0_75 = arith.constant 0 : index
    %156 = vector.load %arg14[%c24_74, %c0_75] : memref<40x160xbf16, #tpu.memory_space<vmem>>, vector<8x160xbf16>
    tpu.vector_store %arg14[%c24_74, %c0_75], %155 {strides = array<i32>} : memref<40x160xbf16, #tpu.memory_space<vmem>>, vector<8x160xbf16>,
    %157 = vector.extract_strided_slice %128 {offsets = [64, 0], sizes = [8, 160], strides = [1, 1]} : vector<80x160xf32> to vector<8x160xf32>
    %158 = vector.extract_strided_slice %128 {offsets = [72, 0], sizes = [8, 160], strides = [1, 1]} : vector<80x160xf32> to vector<8x160xf32>
    %159 = arith.addf %157, %158 : vector<8x160xf32>
    %cst_76 = arith.constant 5.000000e-01 : f32
    %160 = vector.broadcast %cst_76 : f32 to vector<8x160xf32>
    %161 = arith.mulf %160, %159 : vector<8x160xf32>
    %162 = arith.truncf %161 : vector<8x160xf32> to vector<8x160xbf16>
    %c32_77 = arith.constant 32 : index
    %c0_78 = arith.constant 0 : index
    %163 = vector.load %arg14[%c32_77, %c0_78] : memref<40x160xbf16, #tpu.memory_space<vmem>>, vector<8x160xbf16>
    tpu.vector_store %arg14[%c32_77, %c0_78], %162 {strides = array<i32>} : memref<40x160xbf16, #tpu.memory_space<vmem>>, vector<8x160xbf16>,
    %c0_79 = arith.constant 0 : index
    %c0_80 = arith.constant 0 : index
    %164 = vector.load %arg14[%c0_79, %c0_80] : memref<40x160xbf16, #tpu.memory_space<vmem>>, vector<8x160xbf16>
    %c8_81 = arith.constant 8 : index
    %c0_82 = arith.constant 0 : index
    %165 = vector.load %arg14[%c8_81, %c0_82] : memref<40x160xbf16, #tpu.memory_space<vmem>>, vector<8x160xbf16>
    %c16_83 = arith.constant 16 : index
    %c0_84 = arith.constant 0 : index
    %166 = vector.load %arg14[%c16_83, %c0_84] : memref<40x160xbf16, #tpu.memory_space<vmem>>, vector<8x160xbf16>
    %c24_85 = arith.constant 24 : index
    %c0_86 = arith.constant 0 : index
    %167 = vector.load %arg14[%c24_85, %c0_86] : memref<40x160xbf16, #tpu.memory_space<vmem>>, vector<8x160xbf16>
    %c32_87 = arith.constant 32 : index
    %c0_88 = arith.constant 0 : index
    %168 = vector.load %arg14[%c32_87, %c0_88] : memref<40x160xbf16, #tpu.memory_space<vmem>>, vector<8x160xbf16>
    %169 = tpu.concatenate %164, %165, %166, %167, %168 in 1 : vector<8x160xbf16>, vector<8x160xbf16>, vector<8x160xbf16>, vector<8x160xbf16>, vector<8x160xbf16> -> vector<8x800xbf16>
    %c0_89 = arith.constant 0 : index
    %c0_90 = arith.constant 0 : index
    %170 = vector.load %arg6[%c0_89, %c0_90] : memref<800x128xbf16, #tpu.memory_space<vmem>>, vector<800x128xbf16>
    %cst_91 = arith.constant dense<0.000000e+00> : vector<8x128xf32>
    %171 = tpu.matmul %169, %170, %cst_91 {dimension_numbers = #tpu.dot_dimension_numbers<[1], [0], [0], [1], [0, 0, 1, 1], [], []>} : vector<8x800xbf16>, vector<800x128xbf16>, vector<8x128xf32> -> vector<8x128xf32>
    %c0_92 = arith.constant 0 : index
    %c0_93 = arith.constant 0 : index
    %172 = vector.load %arg7[%c0_92, %c0_93] : memref<1x128xf32, #tpu.memory_space<vmem>>, vector<1x128xf32>
    %173 = vector.broadcast %172 : vector<1x128xf32> to vector<8x128xf32>
    %174 = arith.addf %171, %173 : vector<8x128xf32>
    %cst_94 = arith.constant 0.000000e+00 : f32
    %175 = vector.broadcast %cst_94 : f32 to vector<8x128xf32>
    %176 = arith.maximumf %174, %175 : vector<8x128xf32>
    %177 = arith.truncf %176 : vector<8x128xf32> to vector<8x128xbf16>
    %c0_95 = arith.constant 0 : index
    %c0_96 = arith.constant 0 : index
    %178 = vector.load %arg8[%c0_95, %c0_96] : memref<128x128xbf16, #tpu.memory_space<vmem>>, vector<128x128xbf16>
    %cst_97 = arith.constant dense<0.000000e+00> : vector<8x128xf32>
    %179 = tpu.matmul %177, %178, %cst_97 {dimension_numbers = #tpu.dot_dimension_numbers<[1], [0], [0], [1], [0, 0, 1, 1], [], []>} : vector<8x128xbf16>, vector<128x128xbf16>, vector<8x128xf32> -> vector<8x128xf32>
    %c0_98 = arith.constant 0 : index
    %c0_99 = arith.constant 0 : index
    %180 = vector.load %arg9[%c0_98, %c0_99] : memref<1x128xf32, #tpu.memory_space<vmem>>, vector<1x128xf32>
    %181 = vector.broadcast %180 : vector<1x128xf32> to vector<8x128xf32>
    %182 = arith.addf %179, %181 : vector<8x128xf32>
    %cst_100 = arith.constant 0.000000e+00 : f32
    %183 = vector.broadcast %cst_100 : f32 to vector<8x128xf32>
    %184 = arith.maximumf %182, %183 : vector<8x128xf32>
    %185 = arith.truncf %184 : vector<8x128xf32> to vector<8x128xbf16>
    %c0_101 = arith.constant 0 : index
    %c0_102 = arith.constant 0 : index
    %186 = vector.load %arg10[%c0_101, %c0_102] : memref<128x128xbf16, #tpu.memory_space<vmem>>, vector<128x128xbf16>
    %cst_103 = arith.constant dense<0.000000e+00> : vector<8x128xf32>
    %187 = tpu.matmul %185, %186, %cst_103 {dimension_numbers = #tpu.dot_dimension_numbers<[1], [0], [0], [1], [0, 0, 1, 1], [], []>} : vector<8x128xbf16>, vector<128x128xbf16>, vector<8x128xf32> -> vector<8x128xf32>
    %c0_104 = arith.constant 0 : index
    %c0_105 = arith.constant 0 : index
    %188 = vector.load %arg11[%c0_104, %c0_105] : memref<1x128xf32, #tpu.memory_space<vmem>>, vector<1x128xf32>
    %189 = vector.broadcast %188 : vector<1x128xf32> to vector<8x128xf32>
    %190 = arith.addf %187, %189 : vector<8x128xf32>
    %c0_106 = arith.constant 0 : index
    %c0_107 = arith.constant 0 : index
    %c0_108 = arith.constant 0 : index
    %191 = vector.load %arg12[%c0_106, %c0_107, %c0_108] : memref<1x8x128xf32, #tpu.memory_space<vmem>>, vector<1x8x128xf32>
    %192 = vector.shape_cast %191 : vector<1x8x128xf32> to vector<8x128xf32>
    %193 = vector.shape_cast %190 : vector<8x128xf32> to vector<1x8x128xf32>
    tpu.vector_store %arg12[%c0_106, %c0_107, %c0_108], %193 {strides = array<i32>} : memref<1x8x128xf32, #tpu.memory_space<vmem>>, vector<1x8x128xf32>,
    return
  }
  func.func @transform_0(%arg0: i32) -> (i32, i32, i32) {
    %c0_i32 = arith.constant 0 : i32
    %c0_i32_0 = arith.constant 0 : i32
    %c0_i32_1 = arith.constant 0 : i32
    return %arg0, %c0_i32, %c0_i32_0 : i32, i32, i32
  }
  func.func @transform_1(%arg0: i32) -> (i32, i32) {
    %c0_i32 = arith.constant 0 : i32
    %c0_i32_0 = arith.constant 0 : i32
    %c0_i32_1 = arith.constant 0 : i32
    return %c0_i32, %c0_i32_0 : i32, i32
  }
  func.func @transform_2(%arg0: i32) -> (i32, i32) {
    %c0_i32 = arith.constant 0 : i32
    %c0_i32_0 = arith.constant 0 : i32
    %c0_i32_1 = arith.constant 0 : i32
    return %c0_i32, %c0_i32_0 : i32, i32
  }
  func.func @transform_3(%arg0: i32) -> (i32, i32) {
    %c0_i32 = arith.constant 0 : i32
    %c0_i32_0 = arith.constant 0 : i32
    %c0_i32_1 = arith.constant 0 : i32
    return %c0_i32, %c0_i32_0 : i32, i32
  }
  func.func @transform_4(%arg0: i32) -> (i32, i32) {
    %c0_i32 = arith.constant 0 : i32
    %c0_i32_0 = arith.constant 0 : i32
    %c0_i32_1 = arith.constant 0 : i32
    return %c0_i32, %c0_i32_0 : i32, i32
  }
  func.func @transform_5(%arg0: i32) -> (i32, i32) {
    %c0_i32 = arith.constant 0 : i32
    %c0_i32_0 = arith.constant 0 : i32
    %c0_i32_1 = arith.constant 0 : i32
    return %c0_i32, %c0_i32_0 : i32, i32
  }
  func.func @transform_6(%arg0: i32) -> (i32, i32) {
    %c0_i32 = arith.constant 0 : i32
    %c0_i32_0 = arith.constant 0 : i32
    %c0_i32_1 = arith.constant 0 : i32
    return %c0_i32, %c0_i32_0 : i32, i32
  }
  func.func @transform_7(%arg0: i32) -> (i32, i32) {
    %c0_i32 = arith.constant 0 : i32
    %c0_i32_0 = arith.constant 0 : i32
    %c0_i32_1 = arith.constant 0 : i32
    return %c0_i32, %c0_i32_0 : i32, i32
  }
  func.func @transform_8(%arg0: i32) -> (i32, i32) {
    %c0_i32 = arith.constant 0 : i32
    %c0_i32_0 = arith.constant 0 : i32
    %c0_i32_1 = arith.constant 0 : i32
    return %c0_i32, %c0_i32_0 : i32, i32
  }
  func.func @transform_9(%arg0: i32) -> (i32, i32) {
    %c0_i32 = arith.constant 0 : i32
    %c0_i32_0 = arith.constant 0 : i32
    %c0_i32_1 = arith.constant 0 : i32
    return %c0_i32, %c0_i32_0 : i32, i32
  }
  func.func @transform_10(%arg0: i32) -> (i32, i32) {
    %c0_i32 = arith.constant 0 : i32
    %c0_i32_0 = arith.constant 0 : i32
    %c0_i32_1 = arith.constant 0 : i32
    return %c0_i32, %c0_i32_0 : i32, i32
  }
  func.func @transform_11(%arg0: i32) -> (i32, i32, i32) {
    %c0_i32 = arith.constant 0 : i32
    %c0_i32_0 = arith.constant 0 : i32
    %c0_i32_1 = arith.constant 0 : i32
    return %arg0, %c0_i32, %c0_i32_0 : i32, i32, i32
  }
}

</mosaic_0001>

<bundles_post_ra>
// kernel: _lambda_.1
= control target key start
LH: loop header
LB: loop body
LE: loop exit
PB: predicated region body
PF: predicated region fallthrough
CT: control target
= control target key end

     0   :  { %16 = vsyncpa [#allocation5], 0  ;;  %s5179_s0 = inlined_call_operand.vmem [shape: bf16[1,256,32], index: 0, kind: input, shape index: {}]   ;;  %s5180_s1 = inlined_call_operand.vmem [shape: bf16[160,168], index: 1, kind: input, shape index: {}]   ;;  %s5181_s2 = inlined_call_operand.vmem [shape: f32[1,168], index: 2, kind: input, shape index: {}]   ;;  %s5182_s3 = inlined_call_operand.vmem [shape: bf16[840,160], index: 3, kind: input, shape index: {}]   ;;  %s5183_s4 = inlined_call_operand.vmem [shape: f32[1,160], index: 4, kind: input, shape index: {}]   ;;  %s5184_s5 = inlined_call_operand.hbm [shape: bf16[800,128], index: 5, kind: input, shape index: {}]   ;;  %s5185_s6 = inlined_call_operand.vmem [shape: f32[1,128], index: 6, kind: input, shape index: {}]   ;;  %s5186_s7 = inlined_call_operand.hbm [shape: bf16[128,128], index: 7, kind: input, shape index: {}]   ;;  %s5187_s8 = inlined_call_operand.vmem [shape: f32[1,128], index: 8, kind: input, shape index: {}]   ;;  %s5188_s9 = inlined_call_operand.hbm [shape: bf16[128,128], index: 9, kind: input, shape index: {}]   ;;  %s5189_s10 = inlined_call_operand.vmem [shape: f32[1,128], index: 10, kind: input, shape index: {}]   ;;  %s5190_s11 = inlined_call_operand.vmem [shape: f32[1,8,128], index: 11, kind: output, shape index: {}]  }
   0x1   :  { %17 = vsyncpa [#allocation7], 0  ;;  %s4030_s17 = smov [#allocation6]   ;;  %s4031_s19 = smov [#allocation4]  }
   0x2   :  { %s47_s18 = sshll.u32 %s4030_s17, 4  ;;  %s33_s20 = sshll.u32 %s4031_s19, 4  ;;  %s48_s18 = int_to_ptr.vmem [resolvable:$true] %s47_s18  ;;  %s4103_s20 = int_to_ptr.vmem [resolvable:$true] %s33_s20 }
   0x3   :  { %s3960_s23 = scalar_lea.hbm %s5186_s7, 1024 }
   0x4   :  { %p3961_p0 = scmp.ne.s32.totalorder %s5186_s7, %s3960_s23  ;;  %p3964_p1 = scmp.lt.u32.totalorder %s3960_s23, %s5186_s7 }
   0x6   :  { %p3966_p2 = pnand %p3964_p1, %p3961_p0 }
   0x8   :  { %3969 = shalt.err (!%p3966_p2)
}
   0x9   :  { %s3970_s28 = scalar_lea.vmem %s48_s18, 1024  ;;  %p3975_p4 = scmp.lt.s32.totalorder %s48_s18, %s48_s18 }
   0xa   :  { %p3971_p3 = scmp.ne.s32.totalorder %s48_s18, %s3970_s28  ;;  %p3976_p5 = scmp.lt.s32.totalorder %s3970_s28, %s3970_s28 }
   0xc   :  { %p3977_p6 = por %p3976_p5, %p3975_p4 }
   0xe   :  { %p3978_p7 = pnand %p3977_p6, %p3971_p3 }
  0x10   :  { %3981 = shalt.err (!%p3978_p7)
}
  0x11   :  { %s4032_s29 = smov 64   ;;  %s4033_s30 = smov 4  }
  0x12   :  { %53 = dma.hbm_to_vmem [thread:$0]  %s5186_s7, 1024, %s48_s18, [#allocation7], %s4032_s29, %s4032_s29, %s4033_s30  }
  0x13   :  { %s3982_s16 = scalar_lea.hbm %s5184_s5, 6400 }
  0x14   :  { %p3983_p8 = scmp.ne.s32.totalorder %s5184_s5, %s3982_s16  ;;  %p3986_p9 = scmp.lt.u32.totalorder %s3982_s16, %s5184_s5 }
  0x16   :  { %p3988_p10 = pnand %p3986_p9, %p3983_p8 }
  0x18   :  { %3991 = shalt.err (!%p3988_p10)
}
  0x19   :  { %s3992_s23 = scalar_lea.vmem %s4103_s20, 6400  ;;  %p3997_p12 = scmp.lt.s32.totalorder %s4103_s20, %s4103_s20 }
  0x1a   :  { %p3993_p11 = scmp.ne.s32.totalorder %s4103_s20, %s3992_s23  ;;  %p3998_p13 = scmp.lt.s32.totalorder %s3992_s23, %s3992_s23 }
  0x1c   :  { %p3999_p0 = por %p3998_p13, %p3997_p12 }
  0x1e   :  { %p4000_p1 = pnand %p3999_p0, %p3993_p11 }
  0x20   :  { %4003 = shalt.err (!%p4000_p1)
}
  0x21   :  { %39 = dma.hbm_to_vmem [thread:$0]  %s5184_s5, 6400, %s4103_s20, [#allocation5], %s4032_s29, %s4032_s29, %s4033_s30  }
  0x22   :  { %s4034_s24 = smov [#allocation8]   ;;  %s4004_s28 = scalar_lea.hbm %s5188_s9, 1024 }
  0x23   :  { %s61_s25 = sshll.u32 %s4034_s24, 4  ;;  %p4005_p2 = scmp.ne.s32.totalorder %s5188_s9, %s4004_s28  ;;  %s62_s25 = int_to_ptr.vmem [resolvable:$true] %s61_s25 }
  0x24   :  { %p4008_p3 = scmp.lt.u32.totalorder %s4004_s28, %s5188_s9 }
  0x26   :  { %p4010_p4 = pnand %p4008_p3, %p4005_p2 }
  0x28   :  { %4013 = shalt.err (!%p4010_p4)
}
  0x29   :  { %s4014_s16 = scalar_lea.vmem %s62_s25, 1024  ;;  %p4019_p6 = scmp.lt.s32.totalorder %s62_s25, %s62_s25 }
  0x2a   :  { %p4015_p5 = scmp.ne.s32.totalorder %s62_s25, %s4014_s16  ;;  %p4020_p7 = scmp.lt.s32.totalorder %s4014_s16, %s4014_s16 }
  0x2c   :  { %p4021_p8 = por %p4020_p7, %p4019_p6 }
  0x2e   :  { %p4022_p9 = pnand %p4021_p8, %p4015_p5 }
  0x30   :  { %4025 = shalt.err (!%p4022_p9)
}
  0x31   :  { %67 = dma.hbm_to_vmem [thread:$0]  %s5188_s9, 1024, %s62_s25, [#allocation7], %s4032_s29, %s4032_s29, %s4033_s30  }
  0x32   :  { %4026 = dma.done.wait [#allocation5], 6400  }
  0x33   :  { %4027 = vsyncadd [#allocation5], 4294960896 }
  0x34   :  { %4028 = dma.done.wait [#allocation7], 2048  }
  0x35   :  { %4029 = vsyncadd [#allocation7], 4294965248  ;;  %v4158_v0 = vld [vmem:[%s5179_s0 + $0x4] sm:$0xf]  ;;  %v82_v1 = vld [vmem:[%s5179_s0 + $0x8] sm:$0xf] }
  0x36   :  { %v3185_v2 = vcombine.low %v4158_v0, %v82_v1  ;;  %v83_v3 = vld [vmem:[%s5179_s0 + $0xc] sm:$0xf]  ;;  %v84_v4 = vld [vmem:[%s5179_s0 + $0x10] sm:$0xf]  ;;  %v85_v5 = vld [vmem:[%s5179_s0 + $0x14] sm:$0xf] }
  0x37   :  { %v4173_v6 = vcombine.low %v84_v4, %v85_v5  ;;  %v3186_v7 = vcombine.low %v83_v3, %v84_v4  ;;  %s4035_s25 = smov 32   ;;  %v4176_v8 = vcombine.low %v82_v1, %v83_v3  ;;  %vm291_vm0 = vcmask 261120   ;;  %s4036_s26 = smov 96   ;;  %v86_v9 = vld [vmem:[%s5179_s0 + $0x18] sm:$0xf] }
  0x38   :  { %198 = vrot.lane.b32.xlu0 %v3185_v2, %s4035_s25  ;;  %v3187_v10 = vcombine.low %v85_v5, %v86_v9  ;;  %v3688_v11 = vld [vmem:[%s5180_s1 + $0x4] ss:$8 sps:$4 sm:$0xff]   ;;  %v3690_v12 = vld [vmem:[%s5180_s1] ss:$8 sps:$4 sm:$0xff]   ;;  %v87_v13 = vld [vmem:[%s5179_s0 + $0x1c] sm:$0xf] }
  0x39   :  { %260 = vrot.lane.b32.xlu1 %v3186_v7, %s4036_s26  ;;  %3222 = vmatprep.mubr.msk.bf16.mxu0 %vm291_vm0, %v4173_v6  ;;  %v3692_v14 = vld [vmem:[%s5180_s1 + $0x14] ss:$8 sps:$4 sm:$0xff]   ;;  %v3695_v15 = vld [vmem:[%s5180_s1 + $0x10] ss:$8 sps:$4 sm:$0xff]   ;;  %v4205_v16 = vcombine.low %v86_v9, %v87_v13  ;;  %v88_v17 = vld [vmem:[%s5179_s0 + $0x20] sm:$0xf] }
  0x3a   :  { %568 = vmatprep.subr.bf16.mxu0 %v3688_v11  ;;  %v3696_v18 = vld [vmem:[%s5180_s1 + $0x24] ss:$8 sps:$4 sm:$0xff]   ;;  %v3188_v19 = vcombine.low %v87_v13, %v88_v17  ;;  %v3698_v21 = vld [vmem:[%s5180_s1 + $0x20] ss:$8 sps:$4 sm:$0xff]   ;;  %v3700_v22 = vld [vmem:[%s5180_s1 + $0x34] ss:$8 sps:$4 sm:$0xff]  }
  0x3b   :  { %569 = vmatpush1.bf16.msra.mxu0 %v3690_v12  ;;  %v89_v20 = vld [vmem:[%s5179_s0 + $0x24] sm:$0xf]  ;;  %v90_v23 = vld [vmem:[%s5179_s0 + $0x28] sm:$0xf]  ;;  %v3703_v25 = vld [vmem:[%s5180_s1 + $0x30] ss:$8 sps:$4 sm:$0xff]  }
  0x3c   :  { %229 = vrot.lane.b32.xlu0 %v4176_v8, %s4032_s29  ;;  %570 = vmatprep.subr.bf16.mxu0 %v3692_v14  ;;  %v4229_v24 = vcombine.low %v88_v17, %v89_v20  ;;  %v3189_v26 = vcombine.low %v89_v20, %v90_v23  ;;  %v3704_v27 = vld [vmem:[%s5180_s1 + $0x44] ss:$8 sps:$4 sm:$0xff]   ;;  %v92_v29 = vld [vmem:[%s5179_s0 + $0x30] sm:$0xf]  ;;  %v3706_v30 = vld [vmem:[%s5180_s1 + $0x40] ss:$8 sps:$4 sm:$0xff]  }
  0x3d   :  { %200 = vrot.lane.b32.xlu1 %v3186_v7, %s4035_s25  ;;  %v91_v28 = vld [vmem:[%s5179_s0 + $0x2c] sm:$0xf]  ;;  %v3708_v31 = vld [vmem:[%s5180_s1 + $0x54] ss:$8 sps:$4 sm:$0xff]   ;;  %v3711_v33 = vld [vmem:[%s5180_s1 + $0x50] ss:$8 sps:$4 sm:$0xff]  }
  0x3e   :  { %v4253_v32 = vcombine.low %v90_v23, %v91_v28  ;;  %v93_v34 = vld [vmem:[%s5179_s0 + $0x34] sm:$0xf]  ;;  %v3712_v35 = vld [vmem:[%s5180_s1 + $0x64] ss:$8 sps:$4 sm:$0xff]   ;;  %v3190_v36 = vcombine.low %v91_v28, %v92_v29  ;;  %v94_v37 = vld [vmem:[%s5179_s0 + $0x38] sm:$0xf] }
  0x3f   :  { %571 = vmatpush1.bf16.msra.mxu0 %v3695_v15  ;;  %v3714_v38 = vld [vmem:[%s5180_s1 + $0x60] ss:$8 sps:$4 sm:$0xff]   ;;  %v3715_v39 = vld [vmem:[%s5180_s1 + $0x74] ss:$8 sps:$4 sm:$0xff]   ;;  %v4277_v40 = vcombine.low %v92_v29, %v93_v34  ;;  %v3191_v42 = vcombine.low %v93_v34, %v94_v37  ;;  %v3717_v43 = vld [vmem:[%s5180_s1 + $0x70] ss:$8 sps:$4 sm:$0xff]  }
  0x40   :  { %231 = vrot.lane.b32.xlu0 %v4173_v6, %s4032_s29  ;;  %572 = vmatprep.subr.bf16.mxu0 %v3696_v18  ;;  %v95_v41 = vld [vmem:[%s5179_s0 + $0x3c] sm:$0xf]  ;;  %v96_v44 = vld [vmem:[%s5179_s0 + $0x40] sm:$0xf]  ;;  %v3718_v45 = vld [vmem:[%s5180_s1 + $0x84] ss:$8 sps:$4 sm:$0xff]  }
  0x41   :  { %262 = vrot.lane.b32.xlu1 %v3187_v10, %s4036_s26  ;;  %v4295_v46 = vcombine.low %v94_v37, %v95_v41  ;;  %v3720_v47 = vld [vmem:[%s5180_s1 + $0x80] ss:$8 sps:$4 sm:$0xff]   ;;  %v97_v48 = vld [vmem:[%s5179_s0 + $0x44] sm:$0xf]  ;;  %v3721_v49 = vld [vmem:[%s5180_s1 + $0x94] ss:$8 sps:$4 sm:$0xff]   ;;  %v3192_v50 = vcombine.low %v95_v41, %v96_v44 }
  0x42   :  { %v98_v51 = vld [vmem:[%s5179_s0 + $0x48] sm:$0xf]  ;;  %v3723_v52 = vld [vmem:[%s5180_s1 + $0x90] ss:$8 sps:$4 sm:$0xff]   ;;  %v4316_v53 = vcombine.low %v96_v44, %v97_v48  ;;  %v99_v54 = vld [vmem:[%s5179_s0 + $0x4c] sm:$0xf] }
  0x43   :  { %573 = vmatpush1.bf16.msra.mxu0 %v3698_v21  ;;  %v3193_v55 = vcombine.low %v97_v48, %v98_v51  ;;  %v100_v56 = vld [vmem:[%s5179_s0 + $0x50] sm:$0xf]  ;;  %v4328_v57 = vcombine.low %v98_v51, %v99_v54  ;;  %v101_v58 = vld [vmem:[%s5179_s0 + $0x54] sm:$0xf]  ;;  %v102_v60 = vld [vmem:[%s5179_s0 + $0x58] sm:$0xf] }
  0x44   :  { %202 = vrot.lane.b32.xlu0 %v3187_v10, %s4035_s25  ;;  %574 = vmatprep.subr.bf16.mxu0 %v3700_v22  ;;  %v3194_v59 = vcombine.low %v99_v54, %v100_v56  ;;  %v4340_v61 = vcombine.low %v100_v56, %v101_v58  ;;  %v103_v62 = vld [vmem:[%s5179_s0 + $0x5c] sm:$0xf]  ;;  %v3195_v63 = vcombine.low %v101_v58, %v102_v60  ;;  %v104_v1 = vld [vmem:[%s5179_s0 + $0x60] sm:$0xf]  ;;  %v105_v3 = vld [vmem:[%s5179_s0 + $0x64] sm:$0xf] }
  0x45   :  { %233 = vrot.lane.b32.xlu1 %v4205_v16, %s4032_s29  ;;  %v4352_v2 = vcombine.low %v102_v60, %v103_v62  ;;  %v3196_v4 = vcombine.low %v103_v62, %v104_v1  ;;  %v106_v5 = vld [vmem:[%s5179_s0 + $0x68] sm:$0xf]  ;;  %v4364_v7 = vcombine.low %v104_v1, %v105_v3  ;;  %v107_v9 = vld [vmem:[%s5179_s0 + $0x6c] sm:$0xf]  ;;  %v108_v11 = vld [vmem:[%s5179_s0 + $0x70] sm:$0xf] }
  0x46   :  { %v3197_v10 = vcombine.low %v105_v3, %v106_v5  ;;  %v4376_v12 = vcombine.low %v106_v5, %v107_v9  ;;  %v109_v13 = vld [vmem:[%s5179_s0 + $0x74] sm:$0xf]  ;;  %v3198_v14 = vcombine.low %v107_v9, %v108_v11  ;;  %v4385_v15 = vld [vmem:[%s5179_s0 + $0x78] sm:$0xf]  ;;  %vm334_vm1 = vcmask 523264   ;;  %s4037_s24 = smov 40  }
  0x47   :  { %575 = vmatpush1.bf16.msra.mxu0 %v3703_v25  ;;  %v4390_v17 = vcombine.low %v108_v11, %v109_v13  ;;  %v3200_v18 = vcombine.low %v109_v13, %v4385_v15  ;;  %vm363_vm2 = vcmask 785408   ;;  %vm804_vm3 = vcmask 322560   ;;  %s4038_s27 = smov 80   ;;  %s4039_s28 = smov 120  }
  0x48   :  { %264 = vrot.lane.b32.xlu0 %v3188_v19, %s4036_s26  ;;  %576 = vmatprep.subr.bf16.mxu0 %v3704_v27  ;;  %vm819_vm4 = vcmask 326660   ;;  %vm987_vm5 = vcmask 1043456   ;;  %vm1030_vm6 = vcmask 326656   ;;  %vm1058_vm7 = vcmask 654336  }
  0x49   :  { %204 = vrot.lane.b32.xlu1 %v3188_v19, %s4035_s25  ;;  %v80_v19 = vld [vmem:[%s5179_s0] sm:$0xf]  ;;  %vm1100_vm8 = vcmask 982016   ;;  %vm1864_vm9 = vcmask 588800   ;;  %vm2251_vm10 = vcmask 261124   ;;  %vm4042_vm12 = vmmov 0  }
  0x4a   :  { %v3171_v20 = vcombine.low %v80_v19, %v4158_v0  ;;  %vm5102_vm11 = vmor %vm2251_vm10, %vm987_vm5 }
  0x4b   :  { %577 = vmatpush1.bf16.msra.mxu0 %v3706_v30 }
  0x4c   :  { %235 = vrot.lane.b32.xlu0 %v4229_v24, %s4032_s29  ;;  %578 = vmatprep.subr.bf16.mxu0 %v3708_v31 }
  0x4d   :  { %266 = vrot.lane.b32.xlu1 %v3189_v26, %s4036_s26 }
  0x4f   :  { %579 = vmatpush1.bf16.msra.mxu0 %v3711_v33 }
  0x50   :  { %206 = vrot.lane.b32.xlu0 %v3189_v26, %s4035_s25  ;;  %580 = vmatprep.subr.bf16.mxu0 %v3712_v35 }
  0x51   :  { %237 = vrot.lane.b32.xlu1 %v4253_v32, %s4032_s29 }
  0x53   :  { %581 = vmatpush1.bf16.msra.mxu0 %v3714_v38 }
  0x54   :  { %268 = vrot.lane.b32.xlu0 %v3190_v36, %s4036_s26  ;;  %582 = vmatprep.subr.bf16.mxu0 %v3715_v39 }
  0x55   :  { %208 = vrot.lane.b32.xlu1 %v3190_v36, %s4035_s25 }
  0x57   :  { %583 = vmatpush1.bf16.msra.mxu0 %v3717_v43 }
  0x58   :  { %239 = vrot.lane.b32.xlu0 %v4277_v40, %s4032_s29  ;;  %584 = vmatprep.subr.bf16.mxu0 %v3718_v45 }
  0x59   :  { %270 = vrot.lane.b32.xlu1 %v3191_v42, %s4036_s26 }
  0x5b   :  { %585 = vmatpush1.bf16.msra.mxu0 %v3720_v47 }
  0x5c   :  { %210 = vrot.lane.b32.xlu0 %v3191_v42, %s4035_s25  ;;  %586 = vmatprep.subr.bf16.mxu0 %v3721_v49 }
  0x5d   :  { %241 = vrot.lane.b32.xlu1 %v4295_v46, %s4032_s29 }
  0x5f   :  { %587 = vmatpush1.bf16.msra.mxu0 %v3723_v52 }
  0x60   :  { %272 = vrot.lane.b32.xlu0 %v3192_v50, %s4036_s26 }
  0x61   :  { %212 = vrot.lane.b32.xlu1 %v3192_v50, %s4035_s25 }
  0x64   :  { %243 = vrot.lane.b32.xlu0 %v4316_v53, %s4032_s29 }
  0x65   :  { %274 = vrot.lane.b32.xlu1 %v3193_v55, %s4036_s26 }
  0x68   :  { %214 = vrot.lane.b32.xlu0 %v3193_v55, %s4035_s25 }
  0x69   :  { %245 = vrot.lane.b32.xlu1 %v4328_v57, %s4032_s29 }
  0x6c   :  { %276 = vrot.lane.b32.xlu0 %v3194_v59, %s4036_s26 }
  0x6d   :  { %216 = vrot.lane.b32.xlu1 %v3194_v59, %s4035_s25 }
  0x70   :  { %247 = vrot.lane.b32.xlu0 %v4340_v61, %s4032_s29 }
  0x71   :  { %278 = vrot.lane.b32.xlu1 %v3195_v63, %s4036_s26 }
  0x74   :  { %218 = vrot.lane.b32.xlu0 %v3195_v63, %s4035_s25 }
  0x75   :  { %249 = vrot.lane.b32.xlu1 %v4352_v2, %s4032_s29 }
  0x78   :  { %280 = vrot.lane.b32.xlu0 %v3196_v4, %s4036_s26 }
  0x79   :  { %220 = vrot.lane.b32.xlu1 %v3196_v4, %s4035_s25 }
  0x7c   :  { %251 = vrot.lane.b32.xlu0 %v4364_v7, %s4032_s29 }
  0x7d   :  { %282 = vrot.lane.b32.xlu1 %v3197_v10, %s4036_s26 }
  0x80   :  { %222 = vrot.lane.b32.xlu0 %v3197_v10, %s4035_s25 }
  0x81   :  { %253 = vrot.lane.b32.xlu1 %v4376_v12, %s4032_s29 }
  0x84   :  { %284 = vrot.lane.b32.xlu0 %v3198_v14, %s4036_s26 }
  0x85   :  { %224 = vrot.lane.b32.xlu1 %v3198_v14, %s4035_s25 }
  0x88   :  { %255 = vrot.lane.b32.xlu0 %v4390_v17, %s4032_s29 }
  0x89   :  { %286 = vrot.lane.b32.xlu1 %v3200_v18, %s4036_s26 }
  0xaa   :  { %v199_v21 = vpop.permute.xlu0 %198 }
  0xab   :  { %v261_v22 = vpop.permute.xlu1 %260  ;;  %v294_v23 = vsel %vm291_vm0, %v3171_v20, %v199_v21 }
  0xae   :  { %v230_v25 = vpop.permute.xlu0 %229 }
  0xaf   :  { %v336_v26 = vsel %vm334_vm1, %v294_v23, %v230_v25  ;;  %v201_v27 = vpop.permute.xlu1 %200 }
  0xb0   :  { %v365_v28 = vsel %vm363_vm2, %v336_v26, %v261_v22  ;;  %v297_v29 = vsel %vm291_vm0, %v4176_v8, %v201_v27 }
  0xb1   :  { %601 = vmatmul.mubr.bf16.vlgmr.msra.gmra.mrb[0].mxu0 %v365_v28 }
  0xb2   :  { %v232_v30 = vpop.permute.xlu0 %231  ;;  %3223 = vmatprep.mubr.msk.bf16.mxu0 %vm291_vm0, %v4205_v16 }
  0xb3   :  { %v263_v0 = vpop.permute.xlu1 %262  ;;  %v338_v31 = vsel %vm334_vm1, %v297_v29, %v232_v30 }
  0xb4   :  { %v368_v35 = vsel %vm363_vm2, %v338_v31, %v263_v0 }
  0xb6   :  { %v203_v33 = vpop.permute.xlu0 %202 }
  0xb7   :  { %v234_v34 = vpop.permute.xlu1 %233  ;;  %v300_v36 = vsel %vm291_vm0, %v4173_v6, %v203_v33 }
  0xb8   :  { %v340_v8 = vsel %vm334_vm1, %v300_v36, %v234_v34 }
  0xb9   :  { %611 = vmatmul.mubr.bf16.gmra.mrb[4].mxu0 %v368_v35 }
  0xba   :  { %3224 = vmatprep.mubr.msk.bf16.mxu0 %vm291_vm0, %v4229_v24  ;;  %v265_v37 = vpop.permute.xlu0 %264 }
  0xbb   :  { %v205_v38 = vpop.permute.xlu1 %204  ;;  %v371_v39 = vsel %vm363_vm2, %v340_v8, %v265_v37 }
  0xbc   :  { %v303_v42 = vsel %vm291_vm0, %v4205_v16, %v205_v38 }
  0xbe   :  { %v236_v41 = vpop.permute.xlu0 %235 }
  0xbf   :  { %v267_v43 = vpop.permute.xlu1 %266  ;;  %v342_v6 = vsel %vm334_vm1, %v303_v42, %v236_v41 }
  0xc0   :  { %v374_v47 = vsel %vm363_vm2, %v342_v6, %v267_v43 }
  0xc1   :  { %621 = vmatmul.mubr.bf16.gmra.mrb[8].mxu0 %v371_v39 }
  0xc2   :  { %3225 = vmatprep.mubr.msk.bf16.mxu0 %vm291_vm0, %v4253_v32  ;;  %v207_v44 = vpop.permute.xlu0 %206 }
  0xc3   :  { %v238_v45 = vpop.permute.xlu1 %237  ;;  %v306_v48 = vsel %vm291_vm0, %v4229_v24, %v207_v44 }
  0xc4   :  { %v344_v49 = vsel %vm334_vm1, %v306_v48, %v238_v45  ;;  %v3727_v45 = vld [vmem:[%s5182_s3 + $0x4] ss:$8 sps:$4 sm:$0xff]  }
  0xc5   :  { %1887 = vmatprep.subr.bf16.mxu1 %v3727_v45  ;;  %v3733_v48 = vld [vmem:[%s5182_s3 + $0x24] ss:$8 sps:$4 sm:$0xff]  }
  0xc6   :  { %v269_v16 = vpop.permute.xlu0 %268 }
  0xc7   :  { %v209_v50 = vpop.permute.xlu1 %208  ;;  %v377_v51 = vsel %vm363_vm2, %v344_v49, %v269_v16  ;;  %v3735_v49 = vld [vmem:[%s5182_s3 + $0x20] ss:$8 sps:$4 sm:$0xff]   ;;  %v3736_v16 = vld [vmem:[%s5182_s3 + $0x34] ss:$8 sps:$4 sm:$0xff]  }
  0xc8   :  { %v309_v54 = vsel %vm291_vm0, %v4253_v32, %v209_v50  ;;  %v428_v50 = vlaneseq }
  0xc9   :  { %631 = vmatmul.mubr.bf16.gmra.mrb[12].mxu0 %v374_v47  ;;  %v3732_v47 = vld [vmem:[%s5182_s3 + $0x10] ss:$8 sps:$4 sm:$0xff]  }
  0xca   :  { %3226 = vmatprep.mubr.msk.bf16.mxu0 %vm291_vm0, %v4277_v40  ;;  %v240_v52 = vpop.permute.xlu0 %239 }
  0xcb   :  { %v271_v55 = vpop.permute.xlu1 %270  ;;  %v346_v24 = vsel %vm334_vm1, %v309_v54, %v240_v52  ;;  %v3739_v52 = vld [vmem:[%s5182_s3 + $0x44] ss:$8 sps:$4 sm:$0xff]   ;;  %v4512_v54 = vshrl.u32 %v428_v50, 7 }
  0xcc   :  { %v380_v59 = vsel %vm363_vm2, %v346_v24, %v271_v55  ;;  %v3741_v55 = vld [vmem:[%s5182_s3 + $0x40] ss:$8 sps:$4 sm:$0xff]   ;;  %v3742_v24 = vld [vmem:[%s5182_s3 + $0x54] ss:$8 sps:$4 sm:$0xff]  }
  0xce   :  { %v211_v56 = vpop.permute.xlu0 %210 }
  0xcf   :  { %v242_v58 = vpop.permute.xlu1 %241  ;;  %v312_v60 = vsel %vm291_vm0, %v4277_v40, %v211_v56  ;;  %v430_v56 = vsub.s32 0, %v4512_v54 }
  0xd0   :  { %v348_v62 = vsel %vm334_vm1, %v312_v60, %v242_v58  ;;  %v3744_v58 = vld [vmem:[%s5182_s3 + $0x50] ss:$8 sps:$4 sm:$0xff]   ;;  %v434_v60 = vsub.s32 1, %v4512_v54 }
  0xd1   :  { %641 = vmatmul.mubr.bf16.gmra.mrb[16].mxu0 %v377_v51  ;;  %v3738_v51 = vld [vmem:[%s5182_s3 + $0x30] ss:$8 sps:$4 sm:$0xff]  }
  0xd2   :  { %3227 = vmatprep.mubr.msk.bf16.mxu0 %vm291_vm0, %v4295_v46  ;;  %v273_v32 = vpop.permute.xlu0 %272 }
  0xd3   :  { %v213_v63 = vpop.permute.xlu1 %212  ;;  %v383_v1 = vsel %vm363_vm2, %v348_v62, %v273_v32  ;;  %v3745_v62 = vld [vmem:[%s5182_s3 + $0x64] ss:$8 sps:$4 sm:$0xff]  }
  0xd4   :  { %v315_v4 = vsel %vm291_vm0, %v4295_v46, %v213_v63  ;;  %v3747_v63 = vld [vmem:[%s5182_s3 + $0x60] ss:$8 sps:$4 sm:$0xff]  }
  0xd6   :  { %v244_v3 = vpop.permute.xlu0 %243 }
  0xd7   :  { %v275_v5 = vpop.permute.xlu1 %274  ;;  %v350_v40 = vsel %vm334_vm1, %v315_v4, %v244_v3  ;;  %v3748_v4 = vld [vmem:[%s5182_s3 + $0x74] ss:$8 sps:$4 sm:$0xff]  }
  0xd8   :  { %v386_v11 = vsel %vm363_vm2, %v350_v40, %v275_v5 }
  0xd9   :  { %651 = vmatmul.mubr.bf16.gmra.mrb[20].mxu0 %v380_v59  ;;  %v426_v59 = vld [vmem:[%s5181_s2] sm:$0x3] }
  0xda   :  { %3228 = vmatprep.mubr.msk.bf16.mxu0 %vm291_vm0, %v4316_v53  ;;  %v215_v9 = vpop.permute.xlu0 %214  ;;  %v4533_v32 = vrot.slane %v426_v59, %v430_v56 }
  0xdb   :  { %v246_v10 = vpop.permute.xlu1 %245  ;;  %v318_v13 = vsel %vm291_vm0, %v4316_v53, %v215_v9  ;;  %v3750_v9 = vld [vmem:[%s5182_s3 + $0x70] ss:$8 sps:$4 sm:$0xff]  }
  0xdc   :  { %v352_v14 = vsel %vm334_vm1, %v318_v13, %v246_v10 }
  0xde   :  { %v277_v46 = vpop.permute.xlu0 %276 }
  0xdf   :  { %v217_v18 = vpop.permute.xlu1 %216  ;;  %v389_v19 = vsel %vm363_vm2, %v352_v14, %v277_v46 }
  0xe0   :  { %v321_v21 = vsel %vm291_vm0, %v4328_v57, %v217_v18  ;;  %v3751_v18 = vld [vmem:[%s5182_s3 + $0x84] ss:$8 sps:$4 sm:$0xff]  }
  0xe1   :  { %661 = vmatmul.mubr.bf16.gmra.mrb[24].mxu0 %v383_v1  ;;  %v4540_v1 = vrot.slane %v426_v59, %v434_v60 }
  0xe2   :  { %3229 = vmatprep.mubr.msk.bf16.mxu0 %vm291_vm0, %v4328_v57  ;;  %v248_v20 = vpop.permute.xlu0 %247 }
  0xe3   :  { %v279_v22 = vpop.permute.xlu1 %278  ;;  %v354_v53 = vsel %vm334_vm1, %v321_v21, %v248_v20  ;;  %v3753_v21 = vld [vmem:[%s5182_s3 + $0x80] ss:$8 sps:$4 sm:$0xff]  }
  0xe4   :  { %v392_v26 = vsel %vm363_vm2, %v354_v53, %v279_v22 }
  0xe6   :  { %v219_v23 = vpop.permute.xlu0 %218 }
  0xe7   :  { %v250_v25 = vpop.permute.xlu1 %249  ;;  %v324_v27 = vsel %vm291_vm0, %v4340_v61, %v219_v23 }
  0xe8   :  { %v356_v28 = vsel %vm334_vm1, %v324_v27, %v250_v25  ;;  %v3754_v27 = vld [vmem:[%s5182_s3 + $0x94] ss:$8 sps:$4 sm:$0xff]  }
  0xe9   :  { %671 = vmatmul.mubr.bf16.gmra.mrb[28].mxu0 %v386_v11 }
  0xea   :  { %3230 = vmatprep.mubr.msk.bf16.mxu0 %vm291_vm0, %v4340_v61  ;;  %v281_v57 = vpop.permute.xlu0 %280 }
  0xeb   :  { %v221_v29 = vpop.permute.xlu1 %220  ;;  %v395_v30 = vsel %vm363_vm2, %v356_v28, %v281_v57 }
  0xec   :  { %v327_v31 = vsel %vm291_vm0, %v4352_v2, %v221_v29 }
  0xee   :  { %v252_v0 = vpop.permute.xlu0 %251 }
  0xef   :  { %v358_v61 = vsel %vm334_vm1, %v327_v31, %v252_v0  ;;  %v283_v33 = vpop.permute.xlu1 %282 }
  0xf0   :  { %v398_v35 = vsel %vm363_vm2, %v358_v61, %v283_v33 }
  0xf1   :  { %681 = vmatmul.mubr.bf16.gmra.mrb[32].mxu0 %v389_v19 }
  0xf2   :  { %3231 = vmatprep.mubr.msk.bf16.mxu0 %vm291_vm0, %v4352_v2  ;;  %v223_v34 = vpop.permute.xlu0 %222  ;;  %v111_v2 = vld [vmem:[%s5179_s0 + $0x7c] sm:$0xf] }
  0xf3   :  { %v330_v36 = vsel %vm291_vm0, %v4364_v7, %v223_v34  ;;  %v254_v8 = vpop.permute.xlu1 %253  ;;  %v3201_v41 = vcombine.low %v4385_v15, %v111_v2  ;;  %v3729_v15 = vld [vmem:[%s5182_s3] ss:$8 sps:$4 sm:$0xff]   ;;  %v3757_v2 = vld [vmem:[%s5182_s3 + $0xa4] ss:$8 sps:$4 sm:$0xff]  }
  0xf4   :  { %v360_v37 = vsel %vm334_vm1, %v330_v36, %v254_v8  ;;  %1888 = vmatpush1.bf16.msra.mxu1 %v3729_v15 }
  0xf6   :  { %v285_v38 = vpop.permute.xlu0 %284 }
  0xf7   :  { %v225_v39 = vpop.permute.xlu1 %224  ;;  %v401_v42 = vsel %vm363_vm2, %v360_v37, %v285_v38 }
  0xf9   :  { %691 = vmatmul.mubr.bf16.gmra.mrb[36].mxu0 %v392_v26 }
  0xfa   :  { %3232 = vmatprep.mubr.msk.bf16.mxu0 %vm291_vm0, %v4364_v7  ;;  %v333_v7 = vsel %vm291_vm0, %v4376_v12, %v225_v39  ;;  %v256_v43 = vpop.permute.xlu0 %255  ;;  %v3759_v39 = vld [vmem:[%s5182_s3 + $0xa0] ss:$8 sps:$4 sm:$0xff]  }
  0xfb   :  { %v287_v6 = vpop.permute.xlu1 %286 }
 0x101   :  { %701 = vmatmul.mubr.bf16.gmra.mrb[40].mxu0 %v395_v30  ;;  %v3756_v30 = vld [vmem:[%s5182_s3 + $0x90] ss:$8 sps:$4 sm:$0xff]  }
 0x102   :  { %3233 = vmatprep.mubr.msk.bf16.mxu0 %vm291_vm0, %v4376_v12  ;;  %v3730_v12 = vld [vmem:[%s5182_s3 + $0x14] ss:$8 sps:$4 sm:$0xff]  }
 0x103   :  { %1889 = vmatprep.subr.bf16.mxu1 %v3730_v12  ;;  %v3762_v12 = vld [vmem:[%s5182_s3 + $0xb0] ss:$8 sps:$4 sm:$0xff]  }
 0x104   :  { %1890 = vmatpush1.bf16.msra.mxu1 %v3732_v47 }
 0x105   :  { %1891 = vmatprep.subr.bf16.mxu1 %v3733_v48 }
 0x108   :  { %1892 = vmatpush1.bf16.msra.mxu1 %v3735_v49 }
 0x109   :  { %711 = vmatmul.mubr.bf16.gmra.mrb[44].mxu0 %v398_v35  ;;  %1893 = vmatprep.subr.bf16.mxu1 %v3736_v16 }
 0x10a   :  { %3234 = vmatprep.mubr.msk.bf16.mxu0 %vm291_vm0, %v4390_v17  ;;  %v362_v17 = vsel %vm334_vm1, %v333_v7, %v256_v43 }
 0x10b   :  { %v404_v44 = vsel %vm363_vm2, %v362_v17, %v287_v6  ;;  %v3760_v6 = vld [vmem:[%s5182_s3 + $0xb4] ss:$8 sps:$4 sm:$0xff]  }
 0x10c   :  { %1894 = vmatpush1.bf16.msra.mxu1 %v3738_v51 }
 0x10d   :  { %1895 = vmatprep.subr.bf16.mxu1 %v3739_v52 }
 0x110   :  { %1896 = vmatpush1.bf16.msra.mxu1 %v3741_v55 }
 0x111   :  { %721 = vmatmul.mubr.bf16.gmra.mrb[48].mxu0 %v401_v42  ;;  %1897 = vmatprep.subr.bf16.mxu1 %v3742_v24  ;;  %v3763_v24 = vld [vmem:[%s5182_s3 + $0xc4] ss:$8 sps:$4 sm:$0xff]  }
 0x112   :  { %3235 = vmatprep.mubr.msk.bf16.mxu0 %vm291_vm0, %v3201_v41 }
 0x114   :  { %1898 = vmatpush1.bf16.msra.mxu1 %v3744_v58 }
 0x115   :  { %1899 = vmatprep.subr.bf16.mxu1 %v3745_v62 }
 0x118   :  { %1900 = vmatpush1.bf16.msra.mxu1 %v3747_v63  ;;  %v3765_v63 = vld [vmem:[%s5182_s3 + $0xc0] ss:$8 sps:$4 sm:$0xff]  }
 0x119   :  { %731 = vmatmul.mubr.bf16.gmra.mrb[52].mxu0 %v404_v44  ;;  %1901 = vmatprep.subr.bf16.mxu1 %v3748_v4 }
 0x11c   :  { %1902 = vmatpush1.bf16.msra.mxu1 %v3750_v9 }
 0x11d   :  { %1903 = vmatprep.subr.bf16.mxu1 %v3751_v18  ;;  %v3768_v18 = vld [vmem:[%s5182_s3 + $0xd0] ss:$8 sps:$4 sm:$0xff]  }
 0x120   :  { %1904 = vmatpush1.bf16.msra.mxu1 %v3753_v21 }
 0x121   :  { %1905 = vmatprep.subr.bf16.mxu1 %v3754_v27  ;;  %v3769_v27 = vld [vmem:[%s5182_s3 + $0xe4] ss:$8 sps:$4 sm:$0xff]  }
 0x124   :  { %1906 = vmatpush1.bf16.msra.mxu1 %v3756_v30 }
 0x125   :  { %1907 = vmatprep.subr.bf16.mxu1 %v3757_v2  ;;  %v3774_v2 = vld [vmem:[%s5182_s3 + $0xf0] ss:$8 sps:$4 sm:$0xff]  }
 0x128   :  { %1908 = vmatpush1.bf16.msra.mxu1 %v3759_v39 }
 0x129   :  { %1909 = vmatprep.subr.bf16.mxu1 %v3760_v6  ;;  %v3777_v6 = vld [vmem:[%s5182_s3 + $0x104] ss:$8 sps:$4 sm:$0xff]  }
 0x12c   :  { %1910 = vmatpush1.bf16.msra.mxu1 %v3762_v12 }
 0x12d   :  { %1911 = vmatprep.subr.bf16.mxu1 %v3763_v24 }
 0x130   :  { %1912 = vmatpush1.bf16.msra.mxu1 %v3765_v63 }
 0x184   :  { %v602_v3 = vpop.f32.mrb[0].mxu0 }
 0x185   :  { %v603_v5 = vadd.f32 %v602_v3, %v4533_v32  ;;  %v604_v40 = vpop.f32.mrb[1].mxu0 }
 0x186   :  { %v605_v10 = vadd.f32 %v604_v40, %v4540_v1  ;;  %v606_v11 = vpop.f32.mrb[2].mxu0 }
 0x187   :  { %v607_v13 = vadd.f32 %v606_v11, %v4533_v32  ;;  %v608_v14 = vpop.f32.mrb[3].mxu0  ;;  %v741_v19 = vmax.f32 %v603_v5, 0.0  ;;  %v3766_v11 = vld [vmem:[%s5182_s3 + $0xd4] ss:$8 sps:$4 sm:$0xff]  }
 0x188   :  { %v609_v46 = vadd.f32 %v608_v14, %v4540_v1  ;;  %v742_v22 = vmax.f32 %v605_v10, 0.0  ;;  %1913 = vmatprep.subr.bf16.mxu1 %v3766_v11 }
 0x189   :  { %v743_v20 = vmax.f32 %v607_v13, 0.0  ;;  %1914 = vmatpush1.bf16.msra.mxu1 %v3768_v18 }
 0x18a   :  { %v744_v53 = vmax.f32 %v609_v46, 0.0  ;;  %1915 = vmatprep.subr.bf16.mxu1 %v3769_v27 }
 0x18b   :  { %v797_v23 = vadd.f32 %v743_v20, %v741_v19 }
 0x18c   :  { %v798_v25 = vadd.f32 %v744_v53, %v742_v22  ;;  %v612_v26 = vpop.f32.mrb[4].mxu0 }
 0x18d   :  { %v799_v28 = vmul.f32 0.5, %v797_v23  ;;  %v613_v57 = vadd.f32 %v612_v26, %v4533_v32  ;;  %v614_v29 = vpop.f32.mrb[5].mxu0 }
 0x18e   :  { %v800_v0 = vmul.f32 0.5, %v798_v25  ;;  %v615_v31 = vadd.f32 %v614_v29, %v4540_v1  ;;  %v616_v61 = vpop.f32.mrb[6].mxu0  ;;  %v3771_v29 = vld [vmem:[%s5182_s3 + $0xe0] ss:$8 sps:$4 sm:$0xff]  }
 0x18f   :  { %v801_v33 = vpack.c.bf16 %v799_v28, %v799_v28  ;;  %v617_v34 = vadd.f32 %v616_v61, %v4533_v32  ;;  %v618_v35 = vpop.f32.mrb[7].mxu0  ;;  %v745_v37 = vmax.f32 %v613_v57, 0.0  ;;  %1916 = vmatpush1.bf16.msra.mxu1 %v3771_v29 }
 0x190   :  { %v802_v36 = vpack.c.bf16 %v800_v0, %v800_v0  ;;  %v619_v8 = vadd.f32 %v618_v35, %v4540_v1  ;;  %v746_v41 = vmax.f32 %v615_v31, 0.0 }
 0x191   :  { %803 = vst [vmem:[#allocation2] sm:$0xf] %v801_v33  ;;  %v747_v38 = vmax.f32 %v617_v34, 0.0  ;;  %v3772_v34 = vld [vmem:[%s5182_s3 + $0xf4] ss:$8 sps:$4 sm:$0xff]  }
 0x192   :  { %805 = vst.msk [vmem:[#allocation2 + $0x8] sm:$0xf] %vm804_vm3, %v802_v36  ;;  %v748_v42 = vmax.f32 %v619_v8, 0.0  ;;  %1917 = vmatprep.subr.bf16.mxu1 %v3772_v34 }
 0x193   :  { %v806_v7 = vadd.f32 %v747_v38, %v745_v37  ;;  %1918 = vmatpush1.bf16.msra.mxu1 %v3774_v2 }
 0x194   :  { %v807_v43 = vadd.f32 %v748_v42, %v746_v41  ;;  %v622_v17 = vpop.f32.mrb[8].mxu0  ;;  %1970 = vmatprep.subr.bf16.mxu1 %v3777_v6 }
 0x195   :  { %v808_v44 = vmul.f32 0.5, %v806_v7  ;;  %v623_v45 = vadd.f32 %v622_v17, %v4533_v32  ;;  %v624_v15 = vpop.f32.mrb[9].mxu0 }
 0x196   :  { %v809_v47 = vmul.f32 0.5, %v807_v43  ;;  %v625_v48 = vadd.f32 %v624_v15, %v4540_v1  ;;  %v626_v49 = vpop.f32.mrb[10].mxu0 }
 0x197   :  { %v810_v16 = vpack.c.bf16 %v808_v44, %v808_v44  ;;  %v627_v50 = vadd.f32 %v626_v49, %v4533_v32  ;;  %v628_v51 = vpop.f32.mrb[11].mxu0  ;;  %v749_v59 = vmax.f32 %v623_v45, 0.0 }
 0x198   :  { %v811_v52 = vpack.c.bf16 %v809_v47, %v809_v47  ;;  %v629_v55 = vadd.f32 %v628_v51, %v4540_v1  ;;  %v750_v4 = vmax.f32 %v625_v48, 0.0 }
 0x199   :  { %v814_v58 = vrot.slane %v810_v16, 4  ;;  %v751_v62 = vmax.f32 %v627_v50, 0.0 }
 0x19a   :  { %v815_v3 = vrot.slane %v811_v52, 4  ;;  %v752_v5 = vmax.f32 %v629_v55, 0.0 }
 0x19b   :  { %818 = vst [vmem:[#allocation2] sm:$0xf0] %v814_v58  ;;  %v821_v40 = vadd.f32 %v751_v62, %v749_v59 }
 0x19c   :  { %820 = vst.msk [vmem:[#allocation2 + $0x8] sm:$0xf0] %vm819_vm4, %v815_v3  ;;  %v822_v9 = vadd.f32 %v752_v5, %v750_v4  ;;  %v632_v10 = vpop.f32.mrb[12].mxu0 }
 0x19d   :  { %v823_v13 = vmul.f32 0.5, %v821_v40  ;;  %v633_v14 = vadd.f32 %v632_v10, %v4533_v32  ;;  %v634_v46 = vpop.f32.mrb[13].mxu0 }
 0x19e   :  { %v824_v19 = vmul.f32 0.5, %v822_v9  ;;  %v635_v20 = vadd.f32 %v634_v46, %v4540_v1  ;;  %v636_v21 = vpop.f32.mrb[14].mxu0 }
 0x19f   :  { %v825_v22 = vpack.c.bf16 %v823_v13, %v823_v13  ;;  %v637_v53 = vadd.f32 %v636_v21, %v4533_v32  ;;  %v638_v23 = vpop.f32.mrb[15].mxu0  ;;  %v753_v28 = vmax.f32 %v633_v14, 0.0 }
 0x1a0   :  { %v826_v25 = vpack.c.bf16 %v824_v19, %v824_v19  ;;  %v639_v26 = vadd.f32 %v638_v23, %v4540_v1  ;;  %v754_v30 = vmax.f32 %v635_v20, 0.0 }
 0x1a1   :  { %827 = vst [vmem:[#allocation2 + $0x10] sm:$0xf] %v825_v22  ;;  %v755_v57 = vmax.f32 %v637_v53, 0.0 }
 0x1a2   :  { %828 = vst.msk [vmem:[#allocation2 + $0x18] sm:$0xf] %vm804_vm3, %v826_v25  ;;  %v756_v0 = vmax.f32 %v639_v26, 0.0  ;;  %v963_v40 = vld [vmem:[#allocation2] sm:$0xf0] }
 0x1a3   :  { %v829_v31 = vadd.f32 %v755_v57, %v753_v28  ;;  %v988_v18 = vrot.slane %v963_v40, 4 }
 0x1a4   :  { %v830_v61 = vadd.f32 %v756_v0, %v754_v30  ;;  %v642_v33 = vpop.f32.mrb[16].mxu0 }
 0x1a5   :  { %v831_v35 = vmul.f32 0.5, %v829_v31  ;;  %v643_v36 = vadd.f32 %v642_v33, %v4533_v32  ;;  %v644_v8 = vpop.f32.mrb[17].mxu0 }
 0x1a6   :  { %v832_v37 = vmul.f32 0.5, %v830_v61  ;;  %v645_v38 = vadd.f32 %v644_v8, %v4540_v1  ;;  %v646_v39 = vpop.f32.mrb[18].mxu0 }
 0x1a7   :  { %v833_v41 = vpack.c.bf16 %v831_v35, %v831_v35  ;;  %v647_v42 = vadd.f32 %v646_v39, %v4533_v32  ;;  %v648_v7 = vpop.f32.mrb[19].mxu0  ;;  %v757_v45 = vmax.f32 %v643_v36, 0.0 }
 0x1a8   :  { %v834_v43 = vpack.c.bf16 %v832_v37, %v832_v37  ;;  %v649_v17 = vadd.f32 %v648_v7, %v4540_v1  ;;  %v758_v47 = vmax.f32 %v645_v38, 0.0 }
 0x1a9   :  { %v837_v44 = vrot.slane %v833_v41, 4  ;;  %v759_v15 = vmax.f32 %v647_v42, 0.0 }
 0x1aa   :  { %v838_v12 = vrot.slane %v834_v43, 4  ;;  %v760_v48 = vmax.f32 %v649_v17, 0.0 }
 0x1ab   :  { %841 = vst [vmem:[#allocation2 + $0x10] sm:$0xf0] %v837_v44  ;;  %v843_v49 = vadd.f32 %v759_v15, %v757_v45 }
 0x1ac   :  { %842 = vst.msk [vmem:[#allocation2 + $0x18] sm:$0xf0] %vm819_vm4, %v838_v12  ;;  %v844_v16 = vadd.f32 %v760_v48, %v758_v47  ;;  %v652_v50 = vpop.f32.mrb[20].mxu0 }
 0x1ad   :  { %v845_v51 = vmul.f32 0.5, %v843_v49  ;;  %v653_v52 = vadd.f32 %v652_v50, %v4533_v32  ;;  %v654_v55 = vpop.f32.mrb[21].mxu0 }
 0x1ae   :  { %v846_v24 = vmul.f32 0.5, %v844_v16  ;;  %v655_v58 = vadd.f32 %v654_v55, %v4540_v1  ;;  %v656_v59 = vpop.f32.mrb[22].mxu0 }
 0x1af   :  { %v847_v62 = vpack.c.bf16 %v845_v51, %v845_v51  ;;  %v657_v63 = vadd.f32 %v656_v59, %v4533_v32  ;;  %v658_v3 = vpop.f32.mrb[23].mxu0  ;;  %v761_v9 = vmax.f32 %v653_v52, 0.0 }
 0x1b0   :  { %v848_v4 = vpack.c.bf16 %v846_v24, %v846_v24  ;;  %v659_v5 = vadd.f32 %v658_v3, %v4540_v1  ;;  %v762_v11 = vmax.f32 %v655_v58, 0.0 }
 0x1b1   :  { %849 = vst [vmem:[#allocation2 + $0x20] sm:$0xf] %v847_v62  ;;  %v763_v10 = vmax.f32 %v657_v63, 0.0 }
 0x1b2   :  { %850 = vst.msk [vmem:[#allocation2 + $0x28] sm:$0xf] %vm804_vm3, %v848_v4  ;;  %v764_v13 = vmax.f32 %v659_v5, 0.0  ;;  %v4628_v14 = vld [vmem:[#allocation2 + $0x10] sm:$0xff] }
 0x1b3   :  { %v851_v46 = vadd.f32 %v763_v10, %v761_v9  ;;  %v989_v19 = vrot.slane %v4628_v14, 4 }
 0x1b4   :  { %v852_v20 = vadd.f32 %v764_v13, %v762_v11  ;;  %v662_v21 = vpop.f32.mrb[24].mxu0 }
 0x1b5   :  { %v853_v22 = vmul.f32 0.5, %v851_v46  ;;  %v663_v53 = vadd.f32 %v662_v21, %v4533_v32  ;;  %v664_v23 = vpop.f32.mrb[25].mxu0  ;;  %v990_v25 = vsel %vm987_vm5, %v988_v18, %v989_v19 }
 0x1b6   :  { %v854_v26 = vmul.f32 0.5, %v852_v20  ;;  %v665_v27 = vadd.f32 %v664_v23, %v4540_v1  ;;  %v666_v28 = vpop.f32.mrb[26].mxu0  ;;  %1010 = vrot.lane.b32.xlu0 %v990_v25, %s4037_s24 }
 0x1b7   :  { %v855_v57 = vpack.c.bf16 %v853_v22, %v853_v22  ;;  %v667_v29 = vadd.f32 %v666_v28, %v4533_v32  ;;  %v668_v30 = vpop.f32.mrb[27].mxu0  ;;  %v765_v33 = vmax.f32 %v663_v53, 0.0 }
 0x1b8   :  { %v856_v0 = vpack.c.bf16 %v854_v26, %v854_v26  ;;  %v669_v31 = vadd.f32 %v668_v30, %v4540_v1  ;;  %v766_v36 = vmax.f32 %v665_v27, 0.0 }
 0x1b9   :  { %v859_v61 = vrot.slane %v855_v57, 4  ;;  %v767_v34 = vmax.f32 %v667_v29, 0.0 }
 0x1ba   :  { %v860_v35 = vrot.slane %v856_v0, 4  ;;  %v768_v8 = vmax.f32 %v669_v31, 0.0 }
 0x1bb   :  { %863 = vst [vmem:[#allocation2 + $0x20] sm:$0xf0] %v859_v61  ;;  %v865_v2 = vadd.f32 %v767_v34, %v765_v33 }
 0x1bc   :  { %864 = vst.msk [vmem:[#allocation2 + $0x28] sm:$0xf0] %vm819_vm4, %v860_v35  ;;  %v866_v37 = vadd.f32 %v768_v8, %v766_v36  ;;  %v672_v38 = vpop.f32.mrb[28].mxu0 }
 0x1bd   :  { %v867_v39 = vmul.f32 0.5, %v865_v2  ;;  %v673_v41 = vadd.f32 %v672_v38, %v4533_v32  ;;  %v674_v42 = vpop.f32.mrb[29].mxu0 }
 0x1be   :  { %v868_v7 = vmul.f32 0.5, %v866_v37  ;;  %v675_v43 = vadd.f32 %v674_v42, %v4540_v1  ;;  %v676_v17 = vpop.f32.mrb[30].mxu0 }
 0x1bf   :  { %v869_v6 = vpack.c.bf16 %v867_v39, %v867_v39  ;;  %v677_v44 = vadd.f32 %v676_v17, %v4533_v32  ;;  %v678_v45 = vpop.f32.mrb[31].mxu0  ;;  %v769_v47 = vmax.f32 %v673_v41, 0.0 }
 0x1c0   :  { %v870_v15 = vpack.c.bf16 %v868_v7, %v868_v7  ;;  %v679_v12 = vadd.f32 %v678_v45, %v4540_v1  ;;  %v770_v49 = vmax.f32 %v675_v43, 0.0 }
 0x1c1   :  { %871 = vst [vmem:[#allocation2 + $0x30] sm:$0xf] %v869_v6  ;;  %v771_v48 = vmax.f32 %v677_v44, 0.0 }
 0x1c2   :  { %872 = vst.msk [vmem:[#allocation2 + $0x38] sm:$0xf] %vm804_vm3, %v870_v15  ;;  %v772_v16 = vmax.f32 %v679_v12, 0.0  ;;  %v4643_v50 = vld [vmem:[#allocation2 + $0x20] sm:$0xff] }
 0x1c3   :  { %v873_v51 = vadd.f32 %v771_v48, %v769_v47  ;;  %v4646_v52 = vrot.slane %v4643_v50, 4 }
 0x1c4   :  { %v874_v55 = vadd.f32 %v772_v16, %v770_v49  ;;  %v682_v24 = vpop.f32.mrb[32].mxu0 }
 0x1c5   :  { %v875_v58 = vmul.f32 0.5, %v873_v51  ;;  %v683_v59 = vadd.f32 %v682_v24, %v4533_v32  ;;  %v684_v62 = vpop.f32.mrb[33].mxu0  ;;  %v995_v63 = vsel %vm987_vm5, %v989_v19, %v4646_v52 }
 0x1c6   :  { %v876_v3 = vmul.f32 0.5, %v874_v55  ;;  %v685_v4 = vadd.f32 %v684_v62, %v4540_v1  ;;  %v686_v5 = vpop.f32.mrb[34].mxu0  ;;  %1014 = vrot.lane.b32.xlu1 %v995_v63, %s4037_s24 }
 0x1c7   :  { %v877_v40 = vpack.c.bf16 %v875_v58, %v875_v58  ;;  %v687_v9 = vadd.f32 %v686_v5, %v4533_v32  ;;  %v688_v10 = vpop.f32.mrb[35].mxu0  ;;  %v773_v18 = vmax.f32 %v683_v59, 0.0 }
 0x1c8   :  { %v878_v11 = vpack.c.bf16 %v876_v3, %v876_v3  ;;  %v689_v13 = vadd.f32 %v688_v10, %v4540_v1  ;;  %v774_v22 = vmax.f32 %v685_v4, 0.0 }
 0x1c9   :  { %v881_v46 = vrot.slane %v877_v40, 4  ;;  %v775_v20 = vmax.f32 %v687_v9, 0.0 }
 0x1ca   :  { %v882_v21 = vrot.slane %v878_v11, 4  ;;  %v776_v53 = vmax.f32 %v689_v13, 0.0 }
 0x1cb   :  { %885 = vst [vmem:[#allocation2 + $0x30] sm:$0xf0] %v881_v46  ;;  %v887_v19 = vadd.f32 %v775_v20, %v773_v18 }
 0x1cc   :  { %886 = vst.msk [vmem:[#allocation2 + $0x38] sm:$0xf0] %vm819_vm4, %v882_v21  ;;  %v888_v23 = vadd.f32 %v776_v53, %v774_v22  ;;  %v692_v25 = vpop.f32.mrb[36].mxu0 }
 0x1cd   :  { %v889_v26 = vmul.f32 0.5, %v887_v19  ;;  %v693_v27 = vadd.f32 %v692_v25, %v4533_v32  ;;  %v694_v28 = vpop.f32.mrb[37].mxu0 }
 0x1ce   :  { %v890_v57 = vmul.f32 0.5, %v888_v23  ;;  %v695_v29 = vadd.f32 %v694_v28, %v4540_v1  ;;  %v696_v30 = vpop.f32.mrb[38].mxu0 }
 0x1cf   :  { %v891_v0 = vpack.c.bf16 %v889_v26, %v889_v26  ;;  %v697_v31 = vadd.f32 %v696_v30, %v4533_v32  ;;  %v698_v61 = vpop.f32.mrb[39].mxu0  ;;  %v777_v35 = vmax.f32 %v693_v27, 0.0 }
 0x1d0   :  { %v892_v33 = vpack.c.bf16 %v890_v57, %v890_v57  ;;  %v699_v34 = vadd.f32 %v698_v61, %v4540_v1  ;;  %v778_v8 = vmax.f32 %v695_v29, 0.0 }
 0x1d1   :  { %893 = vst [vmem:[#allocation2 + $0x40] sm:$0xf] %v891_v0  ;;  %v779_v36 = vmax.f32 %v697_v31, 0.0 }
 0x1d2   :  { %894 = vst.msk [vmem:[#allocation2 + $0x48] sm:$0xf] %vm804_vm3, %v892_v33  ;;  %v780_v2 = vmax.f32 %v699_v34, 0.0  ;;  %v4661_v37 = vld [vmem:[#allocation2 + $0x30] sm:$0xff] }
 0x1d3   :  { %v895_v38 = vadd.f32 %v779_v36, %v777_v35  ;;  %v998_v39 = vrot.slane %v4661_v37, 4  ;;  %v4693_v36 = vld [vmem:[#allocation2 + $0x18] sm:$0xff] }
 0x1d4   :  { %v896_v41 = vadd.f32 %v780_v2, %v778_v8  ;;  %v702_v42 = vpop.f32.mrb[40].mxu0 }
 0x1d5   :  { %v897_v7 = vmul.f32 0.5, %v895_v38  ;;  %v703_v43 = vadd.f32 %v702_v42, %v4533_v32  ;;  %v704_v17 = vpop.f32.mrb[41].mxu0  ;;  %v4667_v6 = vsel %vm987_vm5, %v4646_v52, %v998_v39 }
 0x1d6   :  { %v898_v44 = vmul.f32 0.5, %v896_v41  ;;  %v705_v45 = vadd.f32 %v704_v17, %v4540_v1  ;;  %v706_v15 = vpop.f32.mrb[42].mxu0  ;;  %1018 = vrot.lane.b32.xlu0 %v4667_v6, %s4037_s24  ;;  %v964_v17 = vld [vmem:[#allocation2 + $0x8] sm:$0xf0] }
 0x1d7   :  { %v899_v12 = vpack.c.bf16 %v897_v7, %v897_v7  ;;  %v707_v47 = vadd.f32 %v706_v15, %v4533_v32  ;;  %v708_v48 = vpop.f32.mrb[43].mxu0  ;;  %v781_v55 = vmax.f32 %v703_v43, 0.0 }
 0x1d8   :  { %v900_v49 = vpack.c.bf16 %v898_v44, %v898_v44  ;;  %v709_v16 = vadd.f32 %v708_v48, %v4540_v1  ;;  %v782_v59 = vmax.f32 %v705_v45, 0.0 }
 0x1d9   :  { %v903_v51 = vrot.slane %v899_v12, 4  ;;  %v783_v24 = vmax.f32 %v707_v47, 0.0  ;;  %v992_v12 = vrot.slane %v4693_v36, 4 }
 0x1da   :  { %v904_v58 = vrot.slane %v900_v49, 4  ;;  %v784_v62 = vmax.f32 %v709_v16, 0.0 }
 0x1db   :  { %907 = vst [vmem:[#allocation2 + $0x40] sm:$0xf0] %v903_v51  ;;  %v909_v63 = vadd.f32 %v783_v24, %v781_v55  ;;  %v991_v51 = vrot.slane %v964_v17, 4 }
 0x1dc   :  { %908 = vst.msk [vmem:[#allocation2 + $0x48] sm:$0xf0] %vm819_vm4, %v904_v58  ;;  %v910_v3 = vadd.f32 %v784_v62, %v782_v59  ;;  %v712_v4 = vpop.f32.mrb[44].mxu0 }
 0x1dd   :  { %v911_v5 = vmul.f32 0.5, %v909_v63  ;;  %v713_v40 = vadd.f32 %v712_v4, %v4533_v32  ;;  %v714_v9 = vpop.f32.mrb[45].mxu0  ;;  %v993_v59 = vsel %vm987_vm5, %v991_v51, %v992_v12  ;;  %v969_v4 = vld [vmem:[#allocation2 + $0x10] sm:$0xf0] }
 0x1de   :  { %v912_v10 = vmul.f32 0.5, %v910_v3  ;;  %v715_v11 = vadd.f32 %v714_v9, %v4540_v1  ;;  %v716_v13 = vpop.f32.mrb[46].mxu0 }
 0x1df   :  { %v913_v46 = vpack.c.bf16 %v911_v5, %v911_v5  ;;  %v785_v18 = vmax.f32 %v713_v40, 0.0  ;;  %v717_v20 = vadd.f32 %v716_v13, %v4533_v32  ;;  %v718_v21 = vpop.f32.mrb[47].mxu0  ;;  %v4707_v5 = vld [vmem:[#allocation2 + $0x28] sm:$0xff] }
 0x1e0   :  { %v914_v22 = vpack.c.bf16 %v912_v10, %v912_v10  ;;  %v786_v53 = vmax.f32 %v715_v11, 0.0  ;;  %v719_v19 = vadd.f32 %v718_v21, %v4540_v1 }
 0x1e1   :  { %915 = vst [vmem:[#allocation2 + $0x50] sm:$0xf] %v913_v46  ;;  %v787_v23 = vmax.f32 %v717_v20, 0.0 }
 0x1e2   :  { %916 = vst.msk [vmem:[#allocation2 + $0x58] sm:$0xf] %vm804_vm3, %v914_v22  ;;  %v788_v25 = vmax.f32 %v719_v19, 0.0  ;;  %v4680_v26 = vld [vmem:[#allocation2 + $0x40] sm:$0xff]  ;;  %v1068_v22 = vrot.slane %v969_v4, 4 }
 0x1e3   :  { %v917_v27 = vadd.f32 %v787_v23, %v785_v18  ;;  %v4683_v28 = vrot.slane %v4680_v26, 4  ;;  %v3778_v4 = vld [vmem:[%s5182_s3 + $0x110] ss:$8 sps:$4 sm:$0xff]  }
 0x1e4   :  { %v918_v57 = vadd.f32 %v788_v25, %v786_v53  ;;  %v722_v29 = vpop.f32.mrb[48].mxu0  ;;  %v996_v53 = vrot.slane %v4707_v5, 4 }
 0x1e5   :  { %v919_v30 = vmul.f32 0.5, %v917_v27  ;;  %v723_v0 = vadd.f32 %v722_v29, %v4533_v32  ;;  %v724_v31 = vpop.f32.mrb[49].mxu0  ;;  %v4688_v61 = vsel %vm987_vm5, %v998_v39, %v4683_v28  ;;  %v4723_v29 = vld [vmem:[#allocation2 + $0x38] sm:$0xff] }
 0x1e6   :  { %v920_v33 = vmul.f32 0.5, %v918_v57  ;;  %v725_v34 = vadd.f32 %v724_v31, %v4540_v1  ;;  %v726_v35 = vpop.f32.mrb[50].mxu0  ;;  %1022 = vrot.lane.b32.xlu1 %v4688_v61, %s4037_s24 }
 0x1e7   :  { %v921_v8 = vpack.c.bf16 %v919_v30, %v919_v30  ;;  %v789_v2 = vmax.f32 %v723_v0, 0.0  ;;  %v727_v38 = vadd.f32 %v726_v35, %v4533_v32  ;;  %v728_v41 = vpop.f32.mrb[51].mxu0 }
 0x1e8   :  { %v922_v42 = vpack.c.bf16 %v920_v33, %v920_v33  ;;  %v790_v7 = vmax.f32 %v725_v34, 0.0  ;;  %v729_v43 = vadd.f32 %v728_v41, %v4540_v1  ;;  %v965_v39 = vld [vmem:[#allocation2 + $0x50] sm:$0xf] }
 0x1e9   :  { %v925_v44 = vrot.slane %v921_v8, 4  ;;  %v791_v45 = vmax.f32 %v727_v38, 0.0  ;;  %v1006_v15 = vrot.slane %v965_v39, 4  ;;  %v4735_v8 = vld [vmem:[#allocation2 + $0x48] sm:$0xff]  ;;  %v966_v41 = vld [vmem:[#allocation2 + $0x58] sm:$0xf] }
 0x1ea   :  { %v926_v47 = vrot.slane %v922_v42, 4  ;;  %v792_v48 = vmax.f32 %v729_v43, 0.0  ;;  %1038 = vrot.lane.b32.xlu1 %v4628_v14, %s4038_s27  ;;  %v970_v39 = vld [vmem:[#allocation2 + $0x18] sm:$0xf0] }
 0x1eb   :  { %929 = vst [vmem:[#allocation2 + $0x50] sm:$0xf0] %v925_v44  ;;  %v931_v49 = vadd.f32 %v791_v45, %v789_v2  ;;  %v1007_v16 = vsel %vm987_vm5, %v4683_v28, %v1006_v15  ;;  %v1004_v2 = vrot.slane %v4735_v8, 4  ;;  %v1070_v45 = vrot.slane %v970_v39, 4 }
 0x1ec   :  { %930 = vst.msk [vmem:[#allocation2 + $0x58] sm:$0xf0] %vm819_vm4, %v926_v47  ;;  %v932_v55 = vadd.f32 %v792_v48, %v790_v7  ;;  %1026 = vrot.lane.b32.xlu0 %v1007_v16, %s4037_s24  ;;  %v732_v24 = vpop.f32.mrb[52].mxu0  ;;  %v1008_v7 = vrot.slane %v966_v41, 4  ;;  %v3819_v41 = vld [vmem:[%s5182_s3 + $0x1e4] ss:$8 sps:$4 sm:$0xff]  }
 0x1ed   :  { %v933_v58 = vmul.f32 0.5, %v931_v49  ;;  %v733_v62 = vadd.f32 %v732_v24, %v4533_v32  ;;  %v734_v63 = vpop.f32.mrb[53].mxu0 }
 0x1ee   :  { %v934_v3 = vmul.f32 0.5, %v932_v55  ;;  %1012 = vrot.lane.b32.xlu1 %v993_v59, %s4037_s24  ;;  %v735_v40 = vadd.f32 %v734_v63, %v4540_v1  ;;  %v736_v9 = vpop.f32.mrb[54].mxu0  ;;  %v1009_v17 = vsel %vm987_vm5, %v1004_v2, %v1008_v7  ;;  %v954_v59 = vld [vmem:[#allocation2 + $0x8] sm:$0xff]  ;;  %v3780_v63 = vld [vmem:[%s5182_s3 + $0x114] ss:$8 sps:$4 sm:$0xff]  }
 0x1ef   :  { %v935_v10 = vpack.c.bf16 %v933_v58, %v933_v58  ;;  %v793_v11 = vmax.f32 %v733_v62, 0.0  ;;  %v737_v13 = vadd.f32 %v736_v9, %v4533_v32  ;;  %v738_v46 = vpop.f32.mrb[55].mxu0  ;;  %v1069_v32 = vsel %vm987_vm5, %v1068_v22, %v4646_v52  ;;  %v3775_v58 = vld [vmem:[%s5182_s3 + $0x100] ss:$8 sps:$4 sm:$0xff]   ;;  %v3783_v9 = vld [vmem:[%s5182_s3 + $0x124] ss:$8 sps:$4 sm:$0xff]  }
 0x1f0   :  { %v936_v18 = vpack.c.bf16 %v934_v3, %v934_v3  ;;  %1040 = vrot.lane.b32.xlu0 %v4693_v36, %s4038_s27  ;;  %v794_v20 = vmax.f32 %v735_v40, 0.0  ;;  %v739_v21 = vadd.f32 %v738_v46, %v4540_v1  ;;  %v997_v1 = vsel %vm987_vm5, %v992_v12, %v996_v53  ;;  %v953_v3 = vld [vmem:[#allocation2] sm:$0xff]  ;;  %v3792_v22 = vld [vmem:[%s5182_s3 + $0x154] ss:$8 sps:$4 sm:$0xff]  }
 0x1f1   :  { %937 = vst [vmem:[#allocation2 + $0x60] sm:$0xf] %v935_v10  ;;  %v795_v19 = vmax.f32 %v737_v13, 0.0  ;;  %v1000_v52 = vrot.slane %v4723_v29, 4  ;;  %v1071_v12 = vsel %vm987_vm5, %v1070_v45, %v996_v53  ;;  %v3781_v10 = vld [vmem:[%s5182_s3 + $0x120] ss:$8 sps:$4 sm:$0xff]  }
 0x1f2   :  { %938 = vst.msk [vmem:[#allocation2 + $0x68] sm:$0xf] %vm804_vm3, %v936_v18  ;;  %1042 = vrot.lane.b32.xlu1 %v4643_v50, %s4038_s27  ;;  %v796_v23 = vmax.f32 %v739_v21, 0.0  ;;  %v3784_v13 = vld [vmem:[%s5182_s3 + $0x130] ss:$8 sps:$4 sm:$0xff]  }
 0x1f3   :  { %v939_v25 = vadd.f32 %v795_v19, %v793_v11  ;;  %v1001_v35 = vsel %vm987_vm5, %v996_v53, %v1000_v52  ;;  %v1005_v38 = vsel %vm987_vm5, %v1000_v52, %v1004_v2  ;;  %v968_v44 = vld [vmem:[#allocation2 + $0x58] sm:$0xff]  ;;  %v3789_v46 = vld [vmem:[%s5182_s3 + $0x144] ss:$8 sps:$4 sm:$0xff]  }
 0x1f4   :  { %1080 = vrot.lane.b32.xlu0 %v1069_v32, %s4039_s28  ;;  %v940_v27 = vadd.f32 %v796_v23, %v794_v20  ;;  %v3786_v11 = vld [vmem:[%s5182_s3 + $0x134] ss:$8 sps:$4 sm:$0xff]   ;;  %v3787_v20 = vld [vmem:[%s5182_s3 + $0x140] ss:$8 sps:$4 sm:$0xff]   ;;  %v3790_v53 = vld [vmem:[%s5182_s3 + $0x150] ss:$8 sps:$4 sm:$0xff]  }
 0x1f5   :  { %v941_v57 = vmul.f32 0.5, %v939_v25  ;;  %v3795_v19 = vld [vmem:[%s5182_s3 + $0x164] ss:$8 sps:$4 sm:$0xff]   ;;  %v3796_v23 = vld [vmem:[%s5182_s3 + $0x170] ss:$8 sps:$4 sm:$0xff]  }
 0x1f6   :  { %1016 = vrot.lane.b32.xlu1 %v997_v1, %s4037_s24  ;;  %v942_v30 = vmul.f32 0.5, %v940_v27  ;;  %v3801_v32 = vld [vmem:[%s5182_s3 + $0x184] ss:$8 sps:$4 sm:$0xff]   ;;  %v3799_v27 = vld [vmem:[%s5182_s3 + $0x180] ss:$8 sps:$4 sm:$0xff]  }
 0x1f7   :  { %v943_v0 = vpack.c.bf16 %v941_v57, %v941_v57  ;;  %v3804_v57 = vld [vmem:[%s5182_s3 + $0x194] ss:$8 sps:$4 sm:$0xff]   ;;  %v3813_v52 = vld [vmem:[%s5182_s3 + $0x1c4] ss:$8 sps:$4 sm:$0xff]  }
 0x1f8   :  { %1044 = vrot.lane.b32.xlu0 %v4707_v5, %s4038_s27  ;;  %v944_v31 = vpack.c.bf16 %v942_v30, %v942_v30  ;;  %v3802_v30 = vld [vmem:[%s5182_s3 + $0x190] ss:$8 sps:$4 sm:$0xff]  }
 0x1f9   :  { %v947_v33 = vrot.slane %v943_v0, 4  ;;  %v972_v48 = vld [vmem:[#allocation2 + $0x68] sm:$0xf]  ;;  %v3807_v0 = vld [vmem:[%s5182_s3 + $0x1a4] ss:$8 sps:$4 sm:$0xff]  }
 0x1fa   :  { %1046 = vrot.lane.b32.xlu1 %v4661_v37, %s4038_s27  ;;  %v948_v34 = vrot.slane %v944_v31, 4  ;;  %v1078_v16 = vrot.slane %v972_v48, 4  ;;  %v3808_v31 = vld [vmem:[%s5182_s3 + $0x1b0] ss:$8 sps:$4 sm:$0xff]  }
 0x1fb   :  { %951 = vst [vmem:[#allocation2 + $0x60] sm:$0xf0] %v947_v33 }
 0x1fc   :  { %1084 = vrot.lane.b32.xlu0 %v4667_v6, %s4039_s28  ;;  %952 = vst.msk [vmem:[#allocation2 + $0x68] sm:$0xf0] %vm819_vm4, %v948_v34  ;;  %v967_v6 = vld [vmem:[#allocation2 + $0x50] sm:$0xff]  ;;  %v3811_v34 = vld [vmem:[%s5182_s3 + $0x1c0] ss:$8 sps:$4 sm:$0xff]  }
 0x1fd   :  { %v1072_v42 = vrot.slane %v967_v6, 4 }
 0x1fe   :  { %1020 = vrot.lane.b32.xlu1 %v1001_v35, %s4037_s24 }
 0x1ff   :  { %v1073_v43 = vsel %vm987_vm5, %v4683_v28, %v1072_v42  ;;  %v1074_v28 = vrot.slane %v968_v44, 4 }
 0x200   :  { %1048 = vrot.lane.b32.xlu0 %v4723_v29, %s4038_s27 }
 0x201   :  { %v1075_v49 = vsel %vm987_vm5, %v1004_v2, %v1074_v28  ;;  %v1079_v51 = vsel %vm987_vm5, %v1074_v28, %v1078_v16  ;;  %v3816_v2 = vld [vmem:[%s5182_s3 + $0x1d4] ss:$8 sps:$4 sm:$0xff]  }
 0x202   :  { %1050 = vrot.lane.b32.xlu1 %v4680_v26, %s4038_s27  ;;  %v973_v55 = vld [vmem:[#allocation2 + $0x60] sm:$0xff]  ;;  %v3828_v28 = vld [vmem:[%s5182_s3 + $0x214] ss:$8 sps:$4 sm:$0xff]  }
 0x203   :  { %v974_v40 = vld [vmem:[#allocation2 + $0x68] sm:$0xff] }
 0x204   :  { %1088 = vrot.lane.b32.xlu0 %v4688_v61, %s4039_s28  ;;  %v971_v61 = vld [vmem:[#allocation2 + $0x60] sm:$0xf] }
 0x205   :  { %v1076_v15 = vrot.slane %v971_v61, 4 }
 0x206   :  { %1024 = vrot.lane.b32.xlu1 %v1005_v38, %s4037_s24 }
 0x207   :  { %v1077_v47 = vsel %vm987_vm5, %v1072_v42, %v1076_v15 }
 0x208   :  { %1052 = vrot.lane.b32.xlu0 %v4735_v8, %s4038_s27 }
 0x20a   :  { %1054 = vrot.lane.b32.xlu1 %v967_v6, %s4038_s27 }
 0x20c   :  { %1092 = vrot.lane.b32.xlu0 %v1073_v43, %s4039_s28  ;;  %v3822_v43 = vld [vmem:[%s5182_s3 + $0x1f4] ss:$8 sps:$4 sm:$0xff]  }
 0x20e   :  { %1028 = vrot.lane.b32.xlu1 %v1009_v17, %s4037_s24  ;;  %v3825_v17 = vld [vmem:[%s5182_s3 + $0x204] ss:$8 sps:$4 sm:$0xff]  }
 0x210   :  { %1056 = vrot.lane.b32.xlu0 %v968_v44, %s4038_s27 }
 0x212   :  { %1082 = vrot.lane.b32.xlu1 %v1071_v12, %s4039_s28 }
 0x214   :  { %1096 = vrot.lane.b32.xlu0 %v1077_v47, %s4039_s28  ;;  %v3823_v47 = vld [vmem:[%s5182_s3 + $0x200] ss:$8 sps:$4 sm:$0xff]  }
 0x216   :  { %1086 = vrot.lane.b32.xlu1 %v1001_v35, %s4039_s28 }
 0x218   :  { %1113 = vrot.lane.b32.xlu0 %v4643_v50, %s4035_s25 }
 0x21a   :  { %1090 = vrot.lane.b32.xlu1 %v1005_v38, %s4039_s28  ;;  %v3814_v38 = vld [vmem:[%s5182_s3 + $0x1d0] ss:$8 sps:$4 sm:$0xff]  }
 0x21c   :  { %1117 = vrot.lane.b32.xlu0 %v4661_v37, %s4035_s25 }
 0x21e   :  { %1094 = vrot.lane.b32.xlu1 %v1075_v49, %s4039_s28 }
 0x220   :  { %1121 = vrot.lane.b32.xlu0 %v4680_v26, %s4035_s25 }
 0x222   :  { %1098 = vrot.lane.b32.xlu1 %v1079_v51, %s4039_s28  ;;  %v3826_v51 = vld [vmem:[%s5182_s3 + $0x210] ss:$8 sps:$4 sm:$0xff]  }
 0x224   :  { %1125 = vrot.lane.b32.xlu0 %v967_v6, %s4035_s25 }
 0x226   :  { %1115 = vrot.lane.b32.xlu1 %v4707_v5, %s4035_s25 }
 0x228   :  { %1129 = vrot.lane.b32.xlu0 %v973_v55, %s4035_s25  ;;  %v4775_v24 = vpop.permute.xlu0 %1010  ;;  %v3831_v55 = vld [vmem:[%s5182_s3 + $0x224] ss:$8 sps:$4 sm:$0xff]  }
 0x229   :  { %v1142_v62 = vsel %vm1030_vm6, %v954_v59, %v4775_v24 }
 0x22a   :  { %1123 = vrot.lane.b32.xlu1 %v4735_v8, %s4035_s25  ;;  %1919 = vmatprep.mubr.bf16.mxu1 %v1142_v62 }
 0x22b   :  { %1920 = vmatmul.mubr.bf16.vlgmr.msra.gmra.mrb[0].mxu1 %v953_v3  ;;  %v3829_v3 = vld [vmem:[%s5182_s3 + $0x220] ss:$8 sps:$4 sm:$0xff]  }
 0x22c   :  { %1971 = vmatpush1.bf16.msra.mxu1 %v3775_v58  ;;  %1119 = vrot.lane.b32.xlu0 %v4723_v29, %s4035_s25 }
 0x22d   :  { %1972 = vmatprep.subr.bf16.mxu1 %v3780_v63 }
 0x22e   :  { %1131 = vrot.lane.b32.xlu1 %v974_v40, %s4035_s25 }
 0x230   :  { %1973 = vmatpush1.bf16.msra.mxu1 %v3778_v4  ;;  %1127 = vrot.lane.b32.xlu0 %v968_v44, %s4035_s25  ;;  %v3834_v4 = vld [vmem:[%s5182_s3 + $0x234] ss:$8 sps:$4 sm:$0xff]  }
 0x231   :  { %1974 = vmatprep.subr.bf16.mxu1 %v3783_v9 }
 0x234   :  { %1975 = vmatpush1.bf16.msra.mxu1 %v3781_v10 }
 0x235   :  { %1976 = vmatprep.subr.bf16.mxu1 %v3786_v11  ;;  %v3832_v11 = vld [vmem:[%s5182_s3 + $0x230] ss:$8 sps:$4 sm:$0xff]  }
 0x238   :  { %1977 = vmatpush1.bf16.msra.mxu1 %v3784_v13  ;;  %v4809_v18 = vpop.permute.xlu1 %1014  ;;  %v3837_v13 = vld [vmem:[%s5182_s3 + $0x244] ss:$8 sps:$4 sm:$0xff]  }
 0x239   :  { %v1146_v21 = vsel %vm1030_vm6, %v4693_v36, %v4809_v18  ;;  %1978 = vmatprep.subr.bf16.mxu1 %v3789_v46  ;;  %v3793_v36 = vld [vmem:[%s5182_s3 + $0x160] ss:$8 sps:$4 sm:$0xff]  }
 0x23a   :  { %1929 = vmatprep.mubr.bf16.mxu1 %v1146_v21 }
 0x23b   :  { %1930 = vmatmul.mubr.bf16.gmra.mrb[4].mxu1 %v4628_v14  ;;  %v3798_v14 = vld [vmem:[%s5182_s3 + $0x174] ss:$8 sps:$4 sm:$0xff]  }
 0x23c   :  { %1979 = vmatpush1.bf16.msra.mxu1 %v3787_v20 }
 0x23d   :  { %1980 = vmatprep.subr.bf16.mxu1 %v3792_v22 }
 0x240   :  { %1981 = vmatpush1.bf16.msra.mxu1 %v3790_v53  ;;  %v3835_v53 = vld [vmem:[%s5182_s3 + $0x240] ss:$8 sps:$4 sm:$0xff]  }
 0x241   :  { %1982 = vmatprep.subr.bf16.mxu1 %v3795_v19  ;;  %v3840_v19 = vld [vmem:[%s5182_s3 + $0x254] ss:$8 sps:$4 sm:$0xff]  }
 0x244   :  { %1983 = vmatpush1.bf16.msra.mxu1 %v3793_v36 }
 0x245   :  { %1984 = vmatprep.subr.bf16.mxu1 %v3798_v14 }
 0x248   :  { %1985 = vmatpush1.bf16.msra.mxu1 %v3796_v23  ;;  %v4839_v25 = vpop.permute.xlu0 %1018 }
 0x249   :  { %v1150_v1 = vsel %vm1030_vm6, %v4707_v5, %v4839_v25  ;;  %1986 = vmatprep.subr.bf16.mxu1 %v3801_v32  ;;  %v3805_v5 = vld [vmem:[%s5182_s3 + $0x1a0] ss:$8 sps:$4 sm:$0xff]   ;;  %v3838_v32 = vld [vmem:[%s5182_s3 + $0x250] ss:$8 sps:$4 sm:$0xff]  }
 0x24a   :  { %1939 = vmatprep.mubr.bf16.mxu1 %v1150_v1 }
 0x24b   :  { %1940 = vmatmul.mubr.bf16.gmra.mrb[8].mxu1 %v4643_v50  ;;  %v3810_v50 = vld [vmem:[%s5182_s3 + $0x1b4] ss:$8 sps:$4 sm:$0xff]  }
 0x24c   :  { %1987 = vmatpush1.bf16.msra.mxu1 %v3799_v27 }
 0x24d   :  { %1988 = vmatprep.subr.bf16.mxu1 %v3804_v57 }
 0x250   :  { %1989 = vmatpush1.bf16.msra.mxu1 %v3802_v30 }
 0x251   :  { %1990 = vmatprep.subr.bf16.mxu1 %v3807_v0 }
 0x254   :  { %1991 = vmatpush1.bf16.msra.mxu1 %v3805_v5  ;;  %v3841_v5 = vld [vmem:[%s5182_s3 + $0x260] ss:$8 sps:$4 sm:$0xff]  }
 0x255   :  { %1992 = vmatprep.subr.bf16.mxu1 %v3810_v50  ;;  %v3846_v50 = vld [vmem:[%s5182_s3 + $0x274] ss:$8 sps:$4 sm:$0xff]  }
 0x258   :  { %1993 = vmatpush1.bf16.msra.mxu1 %v3808_v31  ;;  %v4869_v33 = vpop.permute.xlu1 %1022 }
 0x259   :  { %v1154_v35 = vsel %vm1030_vm6, %v4723_v29, %v4869_v33  ;;  %1994 = vmatprep.subr.bf16.mxu1 %v3813_v52 }
 0x25a   :  { %1949 = vmatprep.mubr.bf16.mxu1 %v1154_v35 }
 0x25b   :  { %1950 = vmatmul.mubr.bf16.gmra.mrb[12].mxu1 %v4661_v37  ;;  %v3817_v37 = vld [vmem:[%s5182_s3 + $0x1e0] ss:$8 sps:$4 sm:$0xff]  }
 0x25c   :  { %1995 = vmatpush1.bf16.msra.mxu1 %v3811_v34  ;;  %v1039_v6 = vpop.permute.xlu1 %1038  ;;  %v3844_v34 = vld [vmem:[%s5182_s3 + $0x270] ss:$8 sps:$4 sm:$0xff]  }
 0x25d   :  { %1996 = vmatprep.subr.bf16.mxu1 %v3816_v2  ;;  %v3849_v2 = vld [vmem:[%s5182_s3 + $0x284] ss:$8 sps:$4 sm:$0xff]  }
 0x25e   :  { %v4887_v29 = vpop.permute.xlu0 %1026 }
 0x25f   :  { %v1158_v42 = vsel %vm1030_vm6, %v4735_v8, %v4887_v29  ;;  %v3820_v8 = vld [vmem:[%s5182_s3 + $0x1f0] ss:$8 sps:$4 sm:$0xff]  }
 0x260   :  { %1997 = vmatpush1.bf16.msra.mxu1 %v3814_v38  ;;  %v1013_v7 = vpop.permute.xlu1 %1012  ;;  %1959 = vmatprep.mubr.bf16.mxu1 %v1158_v42 }
 0x261   :  { %1998 = vmatprep.subr.bf16.mxu1 %v3819_v41  ;;  %v1031_v15 = vsel %vm1030_vm6, %v4775_v24, %v1013_v7 }
 0x262   :  { %v1041_v39 = vpop.permute.xlu0 %1040  ;;  %v1163_v48 = vsel %vm1058_vm7, %v1031_v15, %v1039_v6 }
 0x263   :  { %1960 = vmatmul.mubr.bf16.gmra.mrb[16].mxu1 %v4680_v26  ;;  %v1059_v44 = vsel %vm1058_vm7, %v1039_v6, %v1041_v39 }
 0x264   :  { %1999 = vmatpush1.bf16.msra.mxu1 %v3817_v37  ;;  %v1043_v61 = vpop.permute.xlu1 %1042  ;;  %v3847_v37 = vld [vmem:[%s5182_s3 + $0x280] ss:$8 sps:$4 sm:$0xff]  }
 0x265   :  { %2000 = vmatprep.subr.bf16.mxu1 %v3822_v43  ;;  %v3852_v43 = vld [vmem:[%s5182_s3 + $0x294] ss:$8 sps:$4 sm:$0xff]  }
 0x266   :  { %v4906_v45 = vpop.permute.xlu0 %1080 }
 0x267   :  { %v1184_v26 = vsel %vm1100_vm8, %v1059_v44, %v4906_v45  ;;  %v3850_v44 = vld [vmem:[%s5182_s3 + $0x290] ss:$8 sps:$4 sm:$0xff]  }
 0x268   :  { %2001 = vmatpush1.bf16.msra.mxu1 %v3820_v8  ;;  %v1017_v12 = vpop.permute.xlu1 %1016  ;;  %2002 = vmatprep.mubr.bf16.mxu1 %v1184_v26 }
 0x269   :  { %2053 = vmatprep.subr.bf16.mxu1 %v3825_v17  ;;  %v1032_v59 = vsel %vm1030_vm6, %v4809_v18, %v1017_v12  ;;  %v3853_v12 = vld [vmem:[%s5182_s3 + $0x2a0] ss:$8 sps:$4 sm:$0xff]  }
 0x26a   :  { %v1045_v49 = vpop.permute.xlu0 %1044  ;;  %v1167_v9 = vsel %vm1058_vm7, %v1032_v59, %v1043_v61  ;;  %v3867_v59 = vld [vmem:[%s5182_s3 + $0x2e4] ss:$8 sps:$4 sm:$0xff]  }
 0x26b   :  { %2003 = vmatmul.mubr.bf16.vlgmr.msra.gmra.mrb[0].mxu1 %v1163_v48  ;;  %v1060_v24 = vsel %vm1058_vm7, %v1043_v61, %v1045_v49  ;;  %v3856_v49 = vld [vmem:[%s5182_s3 + $0x2b0] ss:$8 sps:$4 sm:$0xff]  }
 0x26c   :  { %2054 = vmatpush1.bf16.msra.mxu1 %v3823_v47  ;;  %v1047_v16 = vpop.permute.xlu1 %1046  ;;  %v3858_v47 = vld [vmem:[%s5182_s3 + $0x2b4] ss:$8 sps:$4 sm:$0xff]  }
 0x26d   :  { %2055 = vmatprep.subr.bf16.mxu1 %v3828_v28 }
 0x26e   :  { %v4926_v58 = vpop.permute.xlu0 %1084 }
 0x26f   :  { %v1188_v62 = vsel %vm1100_vm8, %v1060_v24, %v4926_v58  ;;  %v3864_v24 = vld [vmem:[%s5182_s3 + $0x2d4] ss:$8 sps:$4 sm:$0xff]  }
 0x270   :  { %2056 = vmatpush1.bf16.msra.mxu1 %v3826_v51  ;;  %v1021_v63 = vpop.permute.xlu1 %1020  ;;  %2012 = vmatprep.mubr.bf16.mxu1 %v1188_v62  ;;  %v3865_v62 = vld [vmem:[%s5182_s3 + $0x2e0] ss:$8 sps:$4 sm:$0xff]  }
 0x271   :  { %2057 = vmatprep.subr.bf16.mxu1 %v3831_v55  ;;  %v1033_v20 = vsel %vm1030_vm6, %v4839_v25, %v1021_v63  ;;  %v3843_v25 = vld [vmem:[%s5182_s3 + $0x264] ss:$8 sps:$4 sm:$0xff]   ;;  %v3859_v55 = vld [vmem:[%s5182_s3 + $0x2c0] ss:$8 sps:$4 sm:$0xff]   ;;  %v3870_v63 = vld [vmem:[%s5182_s3 + $0x2f4] ss:$8 sps:$4 sm:$0xff]  }
 0x272   :  { %v1049_v40 = vpop.permute.xlu0 %1048  ;;  %v1171_v14 = vsel %vm1058_vm7, %v1033_v20, %v1047_v16  ;;  %v3877_v20 = vld [vmem:[%s5182_s3 + $0x320] ss:$8 sps:$4 sm:$0xff]  }
 0x273   :  { %2013 = vmatmul.mubr.bf16.gmra.mrb[4].mxu1 %v1167_v9  ;;  %v1061_v46 = vsel %vm1058_vm7, %v1047_v16, %v1049_v40  ;;  %v3861_v16 = vld [vmem:[%s5182_s3 + $0x2c4] ss:$8 sps:$4 sm:$0xff]   ;;  %v3871_v9 = vld [vmem:[%s5182_s3 + $0x300] ss:$8 sps:$4 sm:$0xff]  }
 0x274   :  { %2058 = vmatpush1.bf16.msra.mxu1 %v3829_v3  ;;  %v1051_v10 = vpop.permute.xlu1 %1050  ;;  %v3868_v3 = vld [vmem:[%s5182_s3 + $0x2f0] ss:$8 sps:$4 sm:$0xff]  }
 0x275   :  { %2059 = vmatprep.subr.bf16.mxu1 %v3834_v4  ;;  %v3873_v4 = vld [vmem:[%s5182_s3 + $0x304] ss:$8 sps:$4 sm:$0xff]  }
 0x276   :  { %v1089_v18 = vpop.permute.xlu0 %1088 }
 0x277   :  { %v1192_v21 = vsel %vm1100_vm8, %v1061_v46, %v1089_v18  ;;  %v3879_v46 = vld [vmem:[%s5182_s3 + $0x324] ss:$8 sps:$4 sm:$0xff]  }
 0x278   :  { %2060 = vmatpush1.bf16.msra.mxu1 %v3832_v11  ;;  %v1025_v22 = vpop.permute.xlu1 %1024  ;;  %2022 = vmatprep.mubr.bf16.mxu1 %v1192_v21  ;;  %v3882_v21 = vld [vmem:[%s5182_s3 + $0x334] ss:$8 sps:$4 sm:$0xff]  }
 0x279   :  { %2061 = vmatprep.subr.bf16.mxu1 %v3837_v13  ;;  %v1034_v57 = vsel %vm1030_vm6, %v4869_v33, %v1025_v22  ;;  %v3874_v13 = vld [vmem:[%s5182_s3 + $0x310] ss:$8 sps:$4 sm:$0xff]   ;;  %v1326_v22 = vld [vmem:[%s5182_s3 + $0x340] sm:$0xff] }
 0x27a   :  { %v1053_v36 = vpop.permute.xlu0 %1052  ;;  %v1175_v52 = vsel %vm1058_vm7, %v1034_v57, %v1051_v10  ;;  %v4040_v57 = vmov 0  }
 0x27b   :  { %2023 = vmatmul.mubr.bf16.gmra.mrb[8].mxu1 %v1171_v14  ;;  %v1062_v27 = vsel %vm1058_vm7, %v1051_v10, %v1053_v36  ;;  %v3876_v10 = vld [vmem:[%s5182_s3 + $0x314] ss:$8 sps:$4 sm:$0xff]   ;;  %v3341_v36 = vcombine.high %v1326_v22, %v1326_v22  ;;  %v3340_v14 = vcombine.low %v1326_v22, %v1326_v22 }
 0x27c   :  { %2062 = vmatpush1.bf16.msra.mxu1 %v3835_v53  ;;  %v1055_v23 = vpop.permute.xlu1 %1054 }
 0x27d   :  { %2063 = vmatprep.subr.bf16.mxu1 %v3840_v19  ;;  %v3880_v19 = vld [vmem:[%s5182_s3 + $0x330] ss:$8 sps:$4 sm:$0xff]  }
 0x27e   :  { %v1093_v1 = vpop.permute.xlu0 %1092 }
 0x27f   :  { %v1196_v30 = vsel %vm1100_vm8, %v1062_v27, %v1093_v1 }
 0x280   :  { %2064 = vmatpush1.bf16.msra.mxu1 %v3838_v32  ;;  %v1029_v0 = vpop.permute.xlu1 %1028  ;;  %2032 = vmatprep.mubr.bf16.mxu1 %v1196_v30  ;;  %v1882_v32 = vsel %vm987_vm5, %v3340_v14, 0 }
 0x281   :  { %2065 = vmatprep.subr.bf16.mxu1 %v3843_v25  ;;  %v1035_v41 = vsel %vm1030_vm6, %v4887_v29, %v1029_v0 }
 0x282   :  { %v1057_v31 = vpop.permute.xlu0 %1056  ;;  %v1179_v29 = vsel %vm1058_vm7, %v1035_v41, %v1055_v23  ;;  %v3892_v41 = vld [vmem:[#allocation4 + $0x48] sm:$0xff]  }
 0x283   :  { %2033 = vmatmul.mubr.bf16.gmra.mrb[12].mxu1 %v1175_v52  ;;  %v1063_v6 = vsel %vm1058_vm7, %v1055_v23, %v1057_v31 }
 0x284   :  { %2066 = vmatpush1.bf16.msra.mxu1 %v3841_v5  ;;  %v1083_v33 = vpop.permute.xlu1 %1082 }
 0x285   :  { %v1101_v35 = vsel %vm1100_vm8, %v4906_v45, %v1083_v33  ;;  %2067 = vmatprep.subr.bf16.mxu1 %v3846_v50  ;;  %v3855_v45 = vld [vmem:[%s5182_s3 + $0x2a4] ss:$8 sps:$4 sm:$0xff]  }
 0x286   :  { %v1097_v38 = vpop.permute.xlu0 %1096 }
 0x287   :  { %v1200_v42 = vsel %vm1100_vm8, %v1063_v6, %v1097_v38  ;;  %v3886_v6 = vld [vmem:[#allocation4 + $0x40] sm:$0xff]  }
 0x288   :  { %2068 = vmatpush1.bf16.msra.mxu1 %v3844_v34  ;;  %v1087_v7 = vpop.permute.xlu1 %1086  ;;  %2042 = vmatprep.mubr.bf16.mxu1 %v1200_v42  ;;  %v3893_v42 = vld [vmem:[#allocation4 + $0x8] sm:$0xff]  }
 0x289   :  { %2069 = vmatprep.subr.bf16.mxu1 %v3849_v2  ;;  %v1102_v39 = vsel %vm1100_vm8, %v4926_v58, %v1087_v7  ;;  %v3862_v58 = vld [vmem:[%s5182_s3 + $0x2d0] ss:$8 sps:$4 sm:$0xff]   ;;  %3438 = vmatprep.subr.bf16.mxu0 %v3886_v6 }
 0x28a   :  { %v4993_v61 = vpop.permute.xlu0 %1113 }
 0x28b   :  { %2043 = vmatmul.mubr.bf16.gmra.mrb[16].mxu1 %v1179_v29  ;;  %v1204_v8 = vsel %vm291_vm0, %v1083_v33, %v4993_v61  ;;  %v3899_v29 = vld [vmem:[#allocation4 + $0x20] sm:$0xff]  }
 0x28c   :  { %2070 = vmatpush1.bf16.msra.mxu1 %v3847_v37  ;;  %v1091_v17 = vpop.permute.xlu1 %1090  ;;  %2085 = vmatprep.mubr.bf16.mxu1 %v1204_v8  ;;  %v3895_v37 = vld [vmem:[#allocation4 + $0x10] sm:$0xff]   ;;  %v3900_v8 = vld [vmem:[#allocation4 + $0x68] sm:$0xff]  }
 0x28d   :  { %2071 = vmatprep.subr.bf16.mxu1 %v3852_v43  ;;  %v1103_v15 = vsel %vm1100_vm8, %v1089_v18, %v1091_v17  ;;  %v3896_v43 = vld [vmem:[#allocation4 + $0x58] sm:$0xff]  }
 0x28e   :  { %v1118_v40 = vpop.permute.xlu0 %1117 }
 0x28f   :  { %v1208_v11 = vsel %vm291_vm0, %v1087_v7, %v1118_v40  ;;  %v3894_v7 = vld [vmem:[#allocation4 + $0x50] sm:$0xff]  }
 0x290   :  { %2072 = vmatpush1.bf16.msra.mxu1 %v3850_v44  ;;  %v1095_v26 = vpop.permute.xlu1 %1094  ;;  %v3902_v44 = vld [vmem:[#allocation4 + $0x70] sm:$0xff]  }
 0x291   :  { %2073 = vmatprep.subr.bf16.mxu1 %v3855_v45  ;;  %v1104_v28 = vsel %vm1100_vm8, %v1093_v1, %v1095_v26  ;;  %v3903_v45 = vld [vmem:[#allocation4 + $0x30] sm:$0xff]  }
 0x292   :  { %v1122_v18 = vpop.permute.xlu0 %1121 }
 0x293   :  { %v1212_v53 = vsel %vm291_vm0, %v1091_v17, %v1122_v18  ;;  %v3901_v17 = vld [vmem:[#allocation4 + $0x28] sm:$0xff]  }
 0x294   :  { %2074 = vmatpush1.bf16.msra.mxu1 %v3853_v12  ;;  %v1099_v48 = vpop.permute.xlu1 %1098  ;;  %v1327_v12 = vld [vmem:[%s5183_s4] sm:$0x3] }
 0x295   :  { %2075 = vmatprep.subr.bf16.mxu1 %v3858_v47  ;;  %v1105_v51 = vsel %vm1100_vm8, %v1097_v38, %v1099_v48  ;;  %v3887_v38 = vld [vmem:[#allocation4] sm:$0xff]   ;;  %v5089_v47 = vrot.slane %v1327_v12, %v430_v56 }
 0x296   :  { %v1126_v23 = vpop.permute.xlu0 %1125  ;;  %3439 = vmatpush3.bf16.msra.mxu0 %v3887_v38 }
 0x297   :  { %v1216_v25 = vsel %vm291_vm0, %v1095_v26, %v1126_v23  ;;  %3440 = vmatprep.subr.bf16.mxu0 %v3892_v41  ;;  %v3905_v26 = vld [vmem:[#allocation4 + $0x38] sm:$0xff]  }
 0x298   :  { %2076 = vmatpush1.bf16.msra.mxu1 %v3856_v49  ;;  %v1116_v30 = vpop.permute.xlu1 %1115 }
 0x299   :  { %2077 = vmatprep.subr.bf16.mxu1 %v3861_v16  ;;  %v1134_v0 = vsel %vm291_vm0, %v4993_v61, %v1116_v30  ;;  %v3898_v61 = vld [vmem:[#allocation4 + $0x60] sm:$0xff]  }
 0x29a   :  { %v1130_v27 = vpop.permute.xlu0 %1129  ;;  %3441 = vmatpush3.bf16.msra.mxu0 %v3893_v42 }
 0x29b   :  { %v1220_v1 = vsel %vm291_vm0, %v1099_v48, %v1130_v27  ;;  %3442 = vmatprep.subr.bf16.mxu0 %v3894_v7 }
 0x29c   :  { %2078 = vmatpush1.bf16.msra.mxu1 %v3859_v55  ;;  %v1124_v31 = vpop.permute.xlu1 %1123 }
 0x29d   :  { %2079 = vmatprep.subr.bf16.mxu1 %v3864_v24  ;;  %v1136_v52 = vsel %vm291_vm0, %v1122_v18, %v1124_v31  ;;  %v3908_v31 = vld [vmem:[#allocation4 + $0xc0] sm:$0xff]  }
 0x29e   :  { %v1120_v5 = vpop.permute.xlu0 %1119  ;;  %3443 = vmatpush3.bf16.msra.mxu0 %v3895_v37 }
 0x29f   :  { %v1135_v50 = vsel %vm291_vm0, %v1118_v40, %v1120_v5  ;;  %3444 = vmatprep.subr.bf16.mxu0 %v3896_v43 }
 0x2a0   :  { %2080 = vmatpush1.bf16.msra.mxu1 %v3862_v58 }
 0x2a1   :  { %2081 = vmatprep.subr.bf16.mxu1 %v3867_v59 }
 0x2a2   :  { %v1128_v33 = vpop.permute.xlu0 %1127 }
 0x2a3   :  { %v1137_v34 = vsel %vm291_vm0, %v1126_v23, %v1128_v33 }
 0x2a4   :  { %2082 = vmatpush1.bf16.msra.mxu1 %v3865_v62 }
 0x2a5   :  { %2083 = vmatprep.subr.bf16.mxu1 %v3870_v63 }
 0x2a8   :  { %2084 = vmatpush1.bf16.msra.mxu1 %v3868_v3 }
 0x2a9   :  { %2136 = vmatprep.subr.bf16.mxu1 %v3873_v4 }
 0x2ab   :  { %2086 = vmatmul.mubr.bf16.vlgmr.msra.gmra.mrb[0].mxu1 %v1101_v35  ;;  %v1132_v35 = vpop.permute.xlu1 %1131 }
 0x2ac   :  { %2095 = vmatprep.mubr.bf16.mxu1 %v1208_v11  ;;  %2137 = vmatpush1.bf16.msra.mxu1 %v3871_v9  ;;  %v1138_v2 = vsel %vm291_vm0, %v1130_v27, %v1132_v35 }
 0x2ad   :  { %2138 = vmatprep.subr.bf16.mxu1 %v3876_v10 }
 0x2b0   :  { %2139 = vmatpush1.bf16.msra.mxu1 %v3874_v13 }
 0x2b1   :  { %2140 = vmatprep.subr.bf16.mxu1 %v3879_v46 }
 0x2b3   :  { %2096 = vmatmul.mubr.bf16.gmra.mrb[4].mxu1 %v1102_v39  ;;  %v3897_v39 = vld [vmem:[#allocation4 + $0x18] sm:$0xff]  }
 0x2b4   :  { %2105 = vmatprep.mubr.bf16.mxu1 %v1212_v53  ;;  %2141 = vmatpush1.bf16.msra.mxu1 %v3877_v20 }
 0x2b5   :  { %2142 = vmatprep.subr.bf16.mxu1 %v3882_v21  ;;  %3445 = vmatpush3.bf16.msra.mxu0 %v3897_v39 }
 0x2b6   :  { %3446 = vmatprep.subr.bf16.mxu0 %v3898_v61 }
 0x2b8   :  { %2143 = vmatpush1.bf16.msra.mxu1 %v3880_v19 }
 0x2b9   :  { %3342 = vmatprep.subr.msk.bf16.mxu1 %vm987_vm5, %v3341_v36  ;;  %3447 = vmatpush3.bf16.msra.mxu0 %v3899_v29 }
 0x2ba   :  { %3448 = vmatprep.subr.bf16.mxu0 %v3900_v8 }
 0x2bb   :  { %2106 = vmatmul.mubr.bf16.gmra.mrb[8].mxu1 %v1103_v15  ;;  %v3904_v15 = vld [vmem:[#allocation4 + $0x78] sm:$0xff]  }
 0x2bc   :  { %2115 = vmatprep.mubr.bf16.mxu1 %v1216_v25  ;;  %2145 = vmatpush1.bf16.msra.mxu1 %v1882_v32 }
 0x2bd   :  { %3449 = vmatpush3.bf16.msra.mxu0 %v3901_v17 }
 0x2be   :  { %3450 = vmatprep.subr.bf16.mxu0 %v3902_v44 }
 0x2c1   :  { %3451 = vmatpush3.bf16.msra.mxu0 %v3903_v45 }
 0x2c2   :  { %3452 = vmatprep.subr.bf16.mxu0 %v3904_v15 }
 0x2c3   :  { %2116 = vmatmul.mubr.bf16.gmra.mrb[12].mxu1 %v1104_v28  ;;  %v5093_v28 = vrot.slane %v1327_v12, %v434_v60 }
 0x2c4   :  { %2125 = vmatprep.mubr.bf16.mxu1 %v1220_v1 }
 0x2c5   :  { %3453 = vmatpush3.bf16.msra.mxu0 %v3905_v26 }
 0x2c6   :  { %3460 = vmatprep.subr.bf16.mxu0 %v3908_v31  ;;  %v3910_v31 = vld [vmem:[#allocation4 + $0xc8] sm:$0xff]  }
 0x2cb   :  { %2126 = vmatmul.mubr.bf16.gmra.mrb[16].mxu1 %v1105_v51 }
 0x2cc   :  { %2168 = vmatprep.mubr.bf16.mxu1 %v4040_v57 }
 0x2d3   :  { %3343 = vmatmul.mubr.msk.bf16.vlgmr.msra.gmra.mrb[0].mxu1 %vm1864_vm9, %v1134_v0 }
 0x2d4   :  { %2178 = vmatprep.mubr.bf16.mxu1 %v4040_v57 }
 0x2db   :  { %3344 = vmatmul.mubr.msk.bf16.gmra.mrb[4].mxu1 %vm1864_vm9, %v1135_v50 }
 0x2dc   :  { %2188 = vmatprep.mubr.bf16.mxu1 %v4040_v57 }
 0x2e3   :  { %3345 = vmatmul.mubr.msk.bf16.gmra.mrb[8].mxu1 %vm1864_vm9, %v1136_v52 }
 0x2e4   :  { %2198 = vmatprep.mubr.bf16.mxu1 %v4040_v57 }
 0x2eb   :  { %3346 = vmatmul.mubr.msk.bf16.gmra.mrb[12].mxu1 %vm1864_vm9, %v1137_v34 }
 0x2ec   :  { %2208 = vmatprep.mubr.bf16.mxu1 %v4040_v57 }
 0x2f3   :  { %3347 = vmatmul.mubr.msk.bf16.gmra.mrb[16].mxu1 %vm1864_vm9, %v1138_v2 }
 0x3a6   :  { %v2170_v48 = vpop.f32.mrb[0].mxu1 }
 0x3a7   :  { %v3573_v49 = vadd.f32 %v2170_v48, %v5089_v47  ;;  %v2172_v16 = vpop.f32.mrb[1].mxu1 }
 0x3a8   :  { %v3574_v51 = vadd.f32 %v2172_v16, %v5093_v28  ;;  %v2174_v55 = vpop.f32.mrb[2].mxu1 }
 0x3a9   :  { %v3575_v24 = vadd.f32 %v2174_v55, %v5089_v47  ;;  %v2176_v58 = vpop.f32.mrb[3].mxu1  ;;  %v2219_v62 = vmax.f32 %v3573_v49, 0.0 }
 0x3aa   :  { %v3576_v59 = vadd.f32 %v2176_v58, %v5093_v28  ;;  %v2220_v56 = vmax.f32 %v3574_v51, 0.0 }
 0x3ab   :  { %v2221_v63 = vmax.f32 %v3575_v24, 0.0 }
 0x3ac   :  { %v2222_v3 = vmax.f32 %v3576_v59, 0.0 }
 0x3ad   :  { %v2239_v4 = vadd.f32 %v2221_v63, %v2219_v62 }
 0x3ae   :  { %v2240_v54 = vadd.f32 %v2222_v3, %v2220_v56  ;;  %v2180_v60 = vpop.f32.mrb[4].mxu1 }
 0x3af   :  { %v2241_v40 = vmul.f32 0.5, %v2239_v4  ;;  %v3577_v9 = vadd.f32 %v2180_v60, %v5089_v47  ;;  %v2182_v10 = vpop.f32.mrb[5].mxu1 }
 0x3b0   :  { %v2242_v11 = vmul.f32 0.5, %v2240_v54  ;;  %v3578_v13 = vadd.f32 %v2182_v10, %v5093_v28  ;;  %v2184_v46 = vpop.f32.mrb[6].mxu1 }
 0x3b1   :  { %v3579_v20 = vadd.f32 %v2184_v46, %v5089_v47  ;;  %v2186_v21 = vpop.f32.mrb[7].mxu1  ;;  %v2223_v19 = vmax.f32 %v3577_v9, 0.0 }
 0x3b2   :  { %v3433_v22 = vpack.c.bf16 %v2242_v11, %v2241_v40  ;;  %v3580_v53 = vadd.f32 %v2186_v21, %v5093_v28  ;;  %v2224_v14 = vmax.f32 %v3578_v13, 0.0 }
 0x3b3   :  { %v2225_v36 = vmax.f32 %v3579_v20, 0.0 }
 0x3b4   :  { %2253 = vst.msk [vmem:[#allocation3] sm:$0xff] %vm5102_vm11, %v3433_v22  ;;  %v2226_v23 = vmax.f32 %v3580_v53, 0.0 }
 0x3b5   :  { %v2254_v32 = vadd.f32 %v2225_v36, %v2223_v19 }
 0x3b6   :  { %v2255_v25 = vadd.f32 %v2226_v23, %v2224_v14  ;;  %v2190_v27 = vpop.f32.mrb[8].mxu1 }
 0x3b7   :  { %v2256_v1 = vmul.f32 0.5, %v2254_v32  ;;  %v3581_v57 = vadd.f32 %v2190_v27, %v5089_v47  ;;  %v2192_v30 = vpop.f32.mrb[9].mxu1 }
 0x3b8   :  { %v2257_v0 = vmul.f32 0.5, %v2255_v25  ;;  %v3582_v5 = vadd.f32 %v2192_v30, %v5093_v28  ;;  %v2194_v50 = vpop.f32.mrb[10].mxu1 }
 0x3b9   :  { %v3583_v52 = vadd.f32 %v2194_v50, %v5089_v47  ;;  %v2196_v33 = vpop.f32.mrb[11].mxu1  ;;  %v2227_v2 = vmax.f32 %v3581_v57, 0.0 }
 0x3ba   :  { %v3434_v34 = vpack.c.bf16 %v2257_v0, %v2256_v1  ;;  %v3584_v35 = vadd.f32 %v2196_v33, %v5093_v28  ;;  %v2228_v38 = vmax.f32 %v3582_v5, 0.0  ;;  %v4041_v1 = vmov 0.0   ;;  %v3909_v5 = vld [vmem:[#allocation4 + $0x80] sm:$0xff]   ;;  %v3912_v33 = vld [vmem:[#allocation4 + $0xd0] sm:$0xff]  }
 0x3bb   :  { %v2229_v6 = vmax.f32 %v3583_v52, 0.0  ;;  %3553 = vmatprep.subr.bf16.mxu1 %v4041_v1  ;;  %3569 = vmatprep.mubr.msk.bf16.mxu1 %vm4042_vm12, %v4041_v1  ;;  %v2306_v57 = vld [vmem:[#allocation3] sm:$0xff]  ;;  %v3911_v52 = vld [vmem:[#allocation4 + $0x88] sm:$0xff]  }
 0x3bc   :  { %2266 = vst.msk [vmem:[#allocation3 + $0x8] sm:$0xff] %vm5102_vm11, %v3434_v34  ;;  %v2230_v41 = vmax.f32 %v3584_v35, 0.0  ;;  %v3354_v30 = vcombine.high %v2306_v57, %v2306_v57  ;;  %v3353_v50 = vcombine.low %v2306_v57, %v2306_v57  ;;  %v3913_v34 = vld [vmem:[#allocation4 + $0x90] sm:$0xff]   ;;  %v3914_v35 = vld [vmem:[#allocation4 + $0xd8] sm:$0xff]  }
 0x3bd   :  { %v2267_v42 = vadd.f32 %v2229_v6, %v2227_v2  ;;  %v3915_v6 = vld [vmem:[#allocation4 + $0x98] sm:$0xff]   ;;  %v3956_v57 = vld [vmem:[#allocation8 + $0x20] sm:$0xff]  }
 0x3be   :  { %v2268_v7 = vadd.f32 %v2230_v41, %v2228_v38  ;;  %v2200_v37 = vpop.f32.mrb[12].mxu1  ;;  %v3916_v41 = vld [vmem:[#allocation4 + $0xe0] sm:$0xff]  }
 0x3bf   :  { %v2269_v43 = vmul.f32 0.5, %v2267_v42  ;;  %v3585_v39 = vadd.f32 %v2200_v37, %v5089_v47  ;;  %v2202_v61 = vpop.f32.mrb[13].mxu1  ;;  %v3917_v37 = vld [vmem:[#allocation4 + $0xa0] sm:$0xff]  }
 0x3c0   :  { %v2270_v29 = vmul.f32 0.5, %v2268_v7  ;;  %v3586_v8 = vadd.f32 %v2202_v61, %v5093_v28  ;;  %v2204_v17 = vpop.f32.mrb[14].mxu1  ;;  %v3919_v61 = vld [vmem:[#allocation4 + $0xa8] sm:$0xff]  }
 0x3c1   :  { %v3587_v44 = vadd.f32 %v2204_v17, %v5089_v47  ;;  %v2206_v45 = vpop.f32.mrb[15].mxu1  ;;  %v2231_v12 = vmax.f32 %v3585_v39, 0.0  ;;  %v3918_v39 = vld [vmem:[#allocation4 + $0xe8] sm:$0xff]   ;;  %v3922_v17 = vld [vmem:[#allocation4 + $0xf8] sm:$0xff]  }
 0x3c2   :  { %v3435_v15 = vpack.c.bf16 %v2270_v29, %v2269_v43  ;;  %v3588_v26 = vadd.f32 %v2206_v45, %v5093_v28  ;;  %v2232_v16 = vmax.f32 %v3586_v8, 0.0  ;;  %v3920_v29 = vld [vmem:[#allocation4 + $0xf0] sm:$0xff]   ;;  %v3923_v45 = vld [vmem:[#allocation4 + $0xb8] sm:$0xff]  }
 0x3c3   :  { %v2233_v48 = vmax.f32 %v3587_v44, 0.0  ;;  %v2307_v49 = vld [vmem:[#allocation3 + $0x8] sm:$0xff]  ;;  %v3921_v8 = vld [vmem:[#allocation4 + $0xb0] sm:$0xff]  }
 0x3c4   :  { %2279 = vst.msk [vmem:[#allocation3 + $0x10] sm:$0xff] %vm5102_vm11, %v3435_v15  ;;  %v2234_v51 = vmax.f32 %v3588_v26, 0.0  ;;  %v3355_v55 = vcombine.low %v2307_v49, %v2307_v49  ;;  %v3356_v23 = vcombine.high %v2307_v49, %v2307_v49  ;;  %v3924_v15 = vld [vmem:[#allocation4 + $0x140] sm:$0xff]   ;;  %v3928_v49 = vld [vmem:[#allocation4 + $0x148] sm:$0xff]  }
 0x3c5   :  { %v2280_v24 = vadd.f32 %v2233_v48, %v2231_v12  ;;  %v3925_v48 = vld [vmem:[#allocation4 + $0x100] sm:$0xff]  }
 0x3c6   :  { %v2281_v58 = vadd.f32 %v2234_v51, %v2232_v16  ;;  %v2210_v59 = vpop.f32.mrb[16].mxu1  ;;  %2322 = vrot.lane.b32.xlu0 %v3355_v55, %s4035_s25  ;;  %v3929_v55 = vld [vmem:[#allocation4 + $0x108] sm:$0xff]  }
 0x3c7   :  { %v2282_v62 = vmul.f32 0.5, %v2280_v24  ;;  %v3589_v63 = vadd.f32 %v2210_v59, %v5089_v47  ;;  %v2212_v56 = vpop.f32.mrb[17].mxu1  ;;  %v3930_v24 = vld [vmem:[#allocation4 + $0x150] sm:$0xff]   ;;  %v3932_v59 = vld [vmem:[#allocation4 + $0x158] sm:$0xff]  }
 0x3c8   :  { %v2283_v3 = vmul.f32 0.5, %v2281_v58  ;;  %v3590_v4 = vadd.f32 %v2212_v56, %v5093_v28  ;;  %v2214_v54 = vpop.f32.mrb[18].mxu1  ;;  %v3931_v58 = vld [vmem:[#allocation4 + $0x110] sm:$0xff]   ;;  %v3935_v56 = vld [vmem:[#allocation4 + $0x120] sm:$0xff]  }
 0x3c9   :  { %v3591_v60 = vadd.f32 %v2214_v54, %v5089_v47  ;;  %v2216_v40 = vpop.f32.mrb[19].mxu1  ;;  %v2235_v11 = vmax.f32 %v3589_v63, 0.0  ;;  %v3934_v63 = vld [vmem:[#allocation4 + $0x160] sm:$0xff]   ;;  %v3938_v54 = vld [vmem:[#allocation4 + $0x170] sm:$0xff]  }
 0x3ca   :  { %v3436_v9 = vpack.c.bf16 %v2283_v3, %v2282_v62  ;;  %v3592_v10 = vadd.f32 %v2216_v40, %v5093_v28  ;;  %v2236_v20 = vmax.f32 %v3590_v4, 0.0  ;;  %v3933_v62 = vld [vmem:[#allocation4 + $0x118] sm:$0xff]   ;;  %v3936_v3 = vld [vmem:[#allocation4 + $0x168] sm:$0xff]  }
 0x3cb   :  { %v2237_v13 = vmax.f32 %v3591_v60, 0.0  ;;  %v2308_v46 = vld [vmem:[#allocation3 + $0x10] sm:$0xff]  ;;  %v3939_v60 = vld [vmem:[#allocation4 + $0x130] sm:$0xff]   ;;  %v3940_v40 = vld [vmem:[#allocation4 + $0x178] sm:$0xff]  }
 0x3cc   :  { %2292 = vst.msk [vmem:[#allocation3 + $0x18] sm:$0xff] %vm5102_vm11, %v3436_v9  ;;  %v2238_v21 = vmax.f32 %v3592_v10, 0.0  ;;  %v3357_v22 = vcombine.low %v2308_v46, %v2308_v46  ;;  %v3358_v53 = vcombine.high %v2308_v46, %v2308_v46  ;;  %v3937_v4 = vld [vmem:[#allocation4 + $0x128] sm:$0xff]   ;;  %v3941_v9 = vld [vmem:[#allocation4 + $0x138] sm:$0xff]  }
 0x3cd   :  { %v2293_v19 = vadd.f32 %v2237_v13, %v2235_v11  ;;  %v3942_v11 = vld [vmem:[#allocation4 + $0x180] sm:$0xff]   ;;  %v3943_v46 = vld [vmem:[#allocation4 + $0x188] sm:$0xff]  }
 0x3ce   :  { %v2294_v36 = vadd.f32 %v2238_v21, %v2236_v20  ;;  %2332 = vrot.lane.b32.xlu1 %v3357_v22, %s4032_s29  ;;  %2334 = vrot.lane.b32.xlu0 %v3358_v53, %s4032_s29  ;;  %v3944_v21 = vld [vmem:[#allocation6] sm:$0xff]   ;;  %v3945_v22 = vld [vmem:[#allocation6 + $0x8] sm:$0xff]   ;;  %v3946_v53 = vld [vmem:[#allocation6 + $0x10] sm:$0xff]  }
 0x3cf   :  { %v2295_v47 = vmul.f32 0.5, %v2293_v19  ;;  %v3947_v19 = vld [vmem:[#allocation6 + $0x18] sm:$0xff]  }
 0x3d0   :  { %v2296_v14 = vmul.f32 0.5, %v2294_v36  ;;  %v3948_v36 = vld [vmem:[#allocation6 + $0x20] sm:$0xff]  }
 0x3d2   :  { %v3437_v28 = vpack.c.bf16 %v2296_v14, %v2295_v47  ;;  %2324 = vrot.lane.b32.xlu1 %v3356_v23, %s4035_s25  ;;  %v3949_v47 = vld [vmem:[#allocation6 + $0x28] sm:$0xff]   ;;  %v3950_v14 = vld [vmem:[#allocation6 + $0x30] sm:$0xff]   ;;  %v3951_v23 = vld [vmem:[#allocation6 + $0x38] sm:$0xff]  }
 0x3d3   :  { %v2309_v32 = vld [vmem:[#allocation3 + $0x18] sm:$0xff] }
 0x3d4   :  { %2305 = vst.msk [vmem:[#allocation3 + $0x20] sm:$0xff] %vm5102_vm11, %v3437_v28  ;;  %v3360_v25 = vcombine.high %v2309_v32, %v2309_v32  ;;  %v3359_v27 = vcombine.low %v2309_v32, %v2309_v32  ;;  %v3952_v28 = vld [vmem:[#allocation8] sm:$0xff]   ;;  %v3953_v32 = vld [vmem:[#allocation8 + $0x8] sm:$0xff]  }
 0x3d5   :  { %3554 = vmatpush3.bf16.msra.mxu1 %v3952_v28 }
 0x3d6   :  { %2345 = vrot.lane.b32.xlu1 %v3360_v25, %s4036_s26  ;;  %2343 = vrot.lane.b32.xlu0 %v3359_v27, %s4036_s26  ;;  %v3954_v25 = vld [vmem:[#allocation8 + $0x10] sm:$0xff]   ;;  %v3955_v27 = vld [vmem:[#allocation8 + $0x18] sm:$0xff]  }
 0x3d7   :  { %3555 = vmatprep.subr.bf16.mxu1 %v4041_v1 }
 0x3d9   :  { %3556 = vmatpush3.bf16.msra.mxu1 %v3953_v32 }
 0x3da   :  { %3557 = vmatprep.subr.bf16.mxu1 %v4041_v1 }
 0x3db   :  { %v2310_v12 = vld [vmem:[#allocation3 + $0x20] sm:$0xff] }
 0x3dc   :  { %v3361_v51 = vcombine.low %v2310_v12, %v2310_v12  ;;  %v3362_v20 = vcombine.high %v2310_v12, %v2310_v12  ;;  %v3959_v12 = vld [vmem:[#allocation8 + $0x38] sm:$0xff]  }
 0x3dd   :  { %3558 = vmatpush3.bf16.msra.mxu1 %v3954_v25 }
 0x3de   :  { %3559 = vmatprep.subr.bf16.mxu1 %v4041_v1 }
 0x3e1   :  { %3560 = vmatpush3.bf16.msra.mxu1 %v3955_v27 }
 0x3e2   :  { %3561 = vmatprep.subr.bf16.mxu1 %v4041_v1 }
 0x3e5   :  { %3562 = vmatpush3.bf16.msra.mxu1 %v3956_v57 }
 0x3e6   :  { %3563 = vmatprep.subr.bf16.mxu1 %v4041_v1 }
 0x438   :  { %v2323_v0 = vpop.permute.xlu0 %2322 }
 0x439   :  { %v2358_v18 = vsel %vm291_vm0, %v3354_v30, %v2323_v0  ;;  %v3957_v30 = vld [vmem:[#allocation8 + $0x28] sm:$0xff]  }
 0x43a   :  { %2810 = vmatprep.mubr.bf16.mxu0 %v2358_v18  ;;  %3564 = vmatpush3.bf16.msra.mxu1 %v3957_v30 }
 0x43b   :  { %2811 = vmatmul.mubr.bf16.vlgmr.msra.gmra.mrb[56].mxu0 %v3353_v50  ;;  %3565 = vmatprep.subr.bf16.mxu1 %v4041_v1 }
 0x43c   :  { %3461 = vmatpush3.bf16.msra.mxu0 %v3909_v5 }
 0x43d   :  { %3462 = vmatprep.subr.bf16.mxu0 %v3910_v31 }
 0x440   :  { %3463 = vmatpush3.bf16.msra.mxu0 %v3911_v52  ;;  %v2335_v2 = vpop.permute.xlu0 %2334  ;;  %v2333_v38 = vpop.permute.xlu1 %2332 }
 0x441   :  { %3464 = vmatprep.subr.bf16.mxu0 %v3912_v33  ;;  %v2337_v42 = vsel %vm334_vm1, %v2333_v38, %v2335_v2  ;;  %v3363_v33 = vld [vmem:[%s5185_s6] ss:$0 sm:$0xff] }
 0x444   :  { %3465 = vmatpush3.bf16.msra.mxu0 %v3913_v34  ;;  %v2325_v44 = vpop.permute.xlu1 %2324 }
 0x445   :  { %3466 = vmatprep.subr.bf16.mxu0 %v3914_v35  ;;  %v2326_v26 = vsel %vm291_vm0, %v2323_v0, %v2325_v44  ;;  %v3958_v0 = vld [vmem:[#allocation8 + $0x30] sm:$0xff]  }
 0x446   :  { %v2362_v16 = vsel %vm334_vm1, %v2326_v26, %v2333_v38  ;;  %3566 = vmatpush3.bf16.msra.mxu1 %v3958_v0 }
 0x447   :  { %3567 = vmatprep.subr.bf16.mxu1 %v4041_v1 }
 0x448   :  { %3467 = vmatpush3.bf16.msra.mxu0 %v3915_v6  ;;  %v2344_v7 = vpop.permute.xlu0 %2343  ;;  %v2346_v10 = vpop.permute.xlu1 %2345 }
 0x449   :  { %3468 = vmatprep.subr.bf16.mxu0 %v3916_v41  ;;  %v2366_v43 = vsel %vm363_vm2, %v2337_v42, %v2344_v7  ;;  %v2348_v13 = vsel %vm363_vm2, %v2344_v7, %v2346_v10 }
 0x44a   :  { %2850 = vmatprep.mubr.bf16.mxu0 %v2366_v43  ;;  %3568 = vmatpush3.bf16.msra.mxu1 %v3959_v12 }
 0x44c   :  { %3469 = vmatpush3.bf16.msra.mxu0 %v3917_v37 }
 0x44d   :  { %3470 = vmatprep.subr.bf16.mxu0 %v3918_v39 }
 0x450   :  { %3471 = vmatpush3.bf16.msra.mxu0 %v3919_v61 }
 0x451   :  { %3472 = vmatprep.subr.bf16.mxu0 %v3920_v29 }
 0x454   :  { %3473 = vmatpush3.bf16.msra.mxu0 %v3921_v8 }
 0x455   :  { %3474 = vmatprep.subr.bf16.mxu0 %v3922_v17 }
 0x458   :  { %3475 = vmatpush3.bf16.msra.mxu0 %v3923_v45 }
 0x459   :  { %3482 = vmatprep.subr.bf16.mxu0 %v3924_v15 }
 0x45b   :  { %2851 = vmatmul.mubr.bf16.vlgmr.msra.gmra.mrb[60].mxu0 %v2362_v16 }
 0x45c   :  { %3483 = vmatpush3.bf16.msra.mxu0 %v3925_v48  ;;  %2890 = vmatprep.mubr.bf16.mxu0 %v3361_v51  ;;  %v3415_v48 = vld [vmem:[%s5187_s8] ss:$0 sm:$0xff] }
 0x45d   :  { %3484 = vmatprep.subr.bf16.mxu0 %v3928_v49 }
 0x460   :  { %3485 = vmatpush3.bf16.msra.mxu0 %v3929_v55 }
 0x461   :  { %3486 = vmatprep.subr.bf16.mxu0 %v3930_v24 }
 0x464   :  { %3487 = vmatpush3.bf16.msra.mxu0 %v3931_v58 }
 0x465   :  { %3488 = vmatprep.subr.bf16.mxu0 %v3932_v59 }
 0x468   :  { %3489 = vmatpush3.bf16.msra.mxu0 %v3933_v62  ;;  %v3424_v62 = vld [vmem:[%s5189_s10] ss:$0 sm:$0xff] }
 0x469   :  { %3490 = vmatprep.subr.bf16.mxu0 %v3934_v63 }
 0x46c   :  { %3491 = vmatpush3.bf16.msra.mxu0 %v3935_v56 }
 0x46d   :  { %3492 = vmatprep.subr.bf16.mxu0 %v3936_v3 }
 0x470   :  { %3493 = vmatpush3.bf16.msra.mxu0 %v3937_v4 }
 0x471   :  { %3494 = vmatprep.subr.bf16.mxu0 %v3938_v54 }
 0x474   :  { %3495 = vmatpush3.bf16.msra.mxu0 %v3939_v60 }
 0x475   :  { %3496 = vmatprep.subr.bf16.mxu0 %v3940_v40 }
 0x478   :  { %3497 = vmatpush3.bf16.msra.mxu0 %v3941_v9 }
 0x479   :  { %3525 = vmatprep.subr.bf16.mxu0 %v4041_v1 }
 0x47b   :  { %2891 = vmatmul.mubr.bf16.vlgmr.msra.gmra.mrb[64].mxu0 %v2348_v13 }
 0x47c   :  { %3526 = vmatpush3.bf16.msra.mxu0 %v3942_v11  ;;  %3529 = vmatprep.mubr.msk.bf16.mxu0 %vm4042_vm12, %v4041_v1 }
 0x47d   :  { %3527 = vmatprep.subr.bf16.mxu0 %v4041_v1 }
 0x480   :  { %3528 = vmatpush3.bf16.msra.mxu0 %v3943_v46 }
 0x481   :  { %3533 = vmatprep.subr.bf16.mxu0 %v4041_v1 }
 0x483   :  { %3530 = vmatmul.mubr.msk.bf16.vlgmr.msra.gmra.mrb[68].mxu0 %vm291_vm0, %v3362_v20 }
 0x484   :  { %3549 = vmatprep.mubr.msk.bf16.mxu0 %vm4042_vm12, %v4041_v1  ;;  %3534 = vmatpush3.bf16.msra.mxu0 %v3944_v21 }
 0x485   :  { %3535 = vmatprep.subr.bf16.mxu0 %v4041_v1 }
 0x488   :  { %3536 = vmatpush3.bf16.msra.mxu0 %v3945_v22 }
 0x489   :  { %3537 = vmatprep.subr.bf16.mxu0 %v4041_v1 }
 0x48c   :  { %3538 = vmatpush3.bf16.msra.mxu0 %v3946_v53 }
 0x48d   :  { %3539 = vmatprep.subr.bf16.mxu0 %v4041_v1 }
 0x490   :  { %3540 = vmatpush3.bf16.msra.mxu0 %v3947_v19 }
 0x491   :  { %3541 = vmatprep.subr.bf16.mxu0 %v4041_v1 }
 0x494   :  { %3542 = vmatpush3.bf16.msra.mxu0 %v3948_v36 }
 0x495   :  { %3543 = vmatprep.subr.bf16.mxu0 %v4041_v1 }
 0x498   :  { %3544 = vmatpush3.bf16.msra.mxu0 %v3949_v47 }
 0x499   :  { %3545 = vmatprep.subr.bf16.mxu0 %v4041_v1 }
 0x49c   :  { %3546 = vmatpush3.bf16.msra.mxu0 %v3950_v14 }
 0x49d   :  { %3547 = vmatprep.subr.bf16.mxu0 %v4041_v1 }
 0x4a0   :  { %3548 = vmatpush3.bf16.msra.mxu0 %v3951_v23 }
 0x50e   :  { %v3454_v5 = vpop.f32.mrb[56].mxu0 }
 0x50f   :  { %v3455_v50 = vpop.f32.mrb[57].mxu0 }
 0x510   :  { %v3456_v18 = vadd.f32 %v3455_v50, %v3454_v5  ;;  %v3457_v31 = vpop.f32.mrb[58].mxu0 }
 0x511   :  { %v3458_v52 = vpop.f32.mrb[59].mxu0 }
 0x512   :  { %v2813_v2 = vadd.f32 %v3456_v18, %v3363_v33 }
 0x52e   :  { %v3476_v34 = vpop.f32.mrb[60].mxu0 }
 0x52f   :  { %v3477_v35 = vpop.f32.mrb[61].mxu0 }
 0x530   :  { %v3478_v6 = vadd.f32 %v3477_v35, %v3476_v34  ;;  %v3479_v38 = vpop.f32.mrb[62].mxu0 }
 0x531   :  { %v3480_v41 = vpop.f32.mrb[63].mxu0 }
 0x532   :  { %v2853_v42 = vadd.f32 %v3478_v6, %v2813_v2 }
 0x54e   :  { %v3498_v7 = vpop.f32.mrb[64].mxu0 }
 0x54f   :  { %v3499_v37 = vpop.f32.mrb[65].mxu0 }
 0x550   :  { %v3500_v43 = vadd.f32 %v3499_v37, %v3498_v7  ;;  %v3501_v1 = vpop.f32.mrb[66].mxu0 }
 0x551   :  { %v3502_v39 = vpop.f32.mrb[67].mxu0 }
 0x552   :  { %v2893_v61 = vadd.f32 %v3500_v43, %v2853_v42 }
 0x556   :  { %v2932_v29 = vpop.f32.mrb[68].mxu0 }
 0x557   :  { %v2933_v8 = vadd.f32 %v2932_v29, %v2893_v61  ;;  %v3531_v17 = vpop.f32.mrb[69].mxu0 }
 0x558   :  { %v2935_v44 = vpop.f32.mrb[70].mxu0 }
 0x559   :  { %v2938_v45 = vmax.f32 %v2933_v8, 0.0  ;;  %v3532_v15 = vpop.f32.mrb[71].mxu0 }
 0x55b   :  { %v2939_v26 = vpack.c.bf16 %v2938_v45, %v2938_v45 }
 0x55d   :  { %3550 = vmatmul.mubr.bf16.vlgmr.msra.gmra.mrb[72].mxu0 %v2939_v26 }
 0x630   :  { %v3045_v49 = vpop.f32.mrb[72].mxu0 }
 0x631   :  { %v3046_v16 = vadd.f32 %v3415_v48, %v3045_v49  ;;  %v3551_v51 = vpop.f32.mrb[73].mxu0 }
 0x632   :  { %v3048_v55 = vpop.f32.mrb[74].mxu0 }
 0x633   :  { %v3051_v24 = vmax.f32 %v3046_v16, 0.0  ;;  %v3552_v58 = vpop.f32.mrb[75].mxu0 }
 0x635   :  { %v3052_v59 = vpack.c.bf16 %v3051_v24, %v3051_v24 }
 0x637   :  { %3570 = vmatmul.mubr.bf16.vlgmr.msra.gmra.mrb[20].mxu1 %v3052_v59 }
 0x70a   :  { %v3158_v63 = vpop.f32.mrb[20].mxu1 }
 0x70b   :  { %v3159_v56 = vadd.f32 %v3424_v62, %v3158_v63  ;;  %v3571_v3 = vpop.f32.mrb[21].mxu1 }
 0x70c   :  { %v3161_v4 = vpop.f32.mrb[22].mxu1 }
 0x70d   :  { %3164 = vst [vmem:[%s5190_s11] sm:$0xff] %v3159_v56  ;;  %v3572_v54 = vpop.f32.mrb[23].mxu1 }
 0x70e   :  { %3169 = vsyncpa [#allocation5], 1 }
 0x70f   :  { %3170 = vsyncpa [#allocation7], 1 }

</bundles_post_ra>
